<compile_context>
chip_gen: v7x
topology: tpu7x:2x2x1
jax: 0.10.0
libtpu: 0.0.40
codegen_flags: <defaults>
</compile_context>

<pallas_src>
import functools

import jax
import jax.numpy as jnp
import numpy as np
from jax.experimental import pallas as pl
from jax.experimental.pallas import tpu as pltpu


def dilconv_kernel(x_ref, wdw_ref, wpw_ref, out_ref, xp_ref, *,
                   ksize, dilation, padding, stride, h1, w1):
    """One batch element, NCHW layout.

    x_ref:   (1, Cin, H, W)      input block (VMEM)
    wdw_ref: (Cin, K*K)          depthwise weights (SMEM scalars)
    wpw_ref: (Cout, Cin)         pointwise weights (SMEM scalars)
    out_ref: (1, Cout, Ho, Wo)   output block (VMEM)
    xp_ref:  (Cin, Hp, Wp)       zero-padded input scratch (VMEM)

    h1, w1 are the stride-1 depthwise output sizes; the stride subsampling is
    applied in-kernel before the pointwise conv.
    """
    cin = x_ref.shape[1]
    h_in = x_ref.shape[2]
    w_in = x_ref.shape[3]
    cout = out_ref.shape[1]

    # ---- in-kernel zero padding (no extra HBM round trip in the wrapper) ---
    xp_ref[...] = jnp.zeros_like(xp_ref)
    xp_ref[:, padding:padding + h_in, padding:padding + w_in] = x_ref[0]

    # ---- depthwise dilated conv: per-channel scalar * slab FMAs (VPU) ------
    dw = []
    for c in range(cin):
        xc = xp_ref[c]                                          # (Hp, Wp)
        # Hoist the kx (lane-axis) shifts out of the ky loop:
        # K column-shifted views instead of K*K doubly-shifted taps.
        cols = [xc[:, kx * dilation:kx * dilation + w1] for kx in range(ksize)]
        acc = jnp.zeros((h1, w1), jnp.float32)
        for ky in range(ksize):
            oy = ky * dilation
            for kx in range(ksize):
                tap = cols[kx][oy:oy + h1, :]                   # (h1, w1)
                acc = acc + tap.astype(jnp.float32) * wdw_ref[c, ky * ksize + kx]
        if stride > 1:
            # In-kernel stride: subsample before the pointwise conv.
            acc = acc[::stride, ::stride]
        dw.append(acc)                                          # (Ho, Wo) f32

    # ---- pointwise 1x1 conv: Cout x Cin scalar * slab FMAs (skip the MXU) --
    for co in range(cout):
        y = dw[0] * wpw_ref[co, 0]
        for ci in range(1, cin):
            y = y + dw[ci] * wpw_ref[co, ci]
        out_ref[0, co] = y.astype(out_ref.dtype)


def _ceil_to(x, m):
    return ((int(x) + m - 1) // m) * m


def _tile_padded_bytes(shape, itemsize):
    """VMEM bytes of a buffer after (8,128) sublane/lane tile padding."""
    shape = tuple(int(d) for d in shape)
    if len(shape) == 0:
        return itemsize
    if len(shape) == 1:
        return _ceil_to(shape[0], 128) * itemsize
    *lead, s, l = shape
    n = 1
    for d in lead:
        n *= d
    return n * _ceil_to(s, 8) * _ceil_to(l, 128) * itemsize


@functools.partial(jax.jit,
                   static_argnames=("kernel_size", "stride", "padding",
                                    "dilation"))
def dil_conv(x, w_dw, w_pw, *, kernel_size=3, stride=1, padding=2, dilation=2):
    """DilConv forward.  x: (B, Cin, H, W) NCHW; returns (B, Cout, Ho, Wo)."""
    b, cin, h, w = x.shape
    cout = w_pw.shape[0]
    k = kernel_size

    # stride-1 depthwise output size; the kernel subsamples in-kernel.
    h1 = h + 2 * padding - dilation * (k - 1)
    w1 = w + 2 * padding - dilation * (k - 1)
    assert h1 >= 1 and w1 >= 1, "kernel/dilation too large for input"
    ho = (h1 - 1) // stride + 1
    wo = (w1 - 1) // stride + 1
    hp, wp = h + 2 * padding, w + 2 * padding

    # Weight layouts: depthwise (Cin,1,K,K) -> (Cin, K*K) SMEM scalars,
    # pointwise (Cout,Cin,1,1) -> (Cout, Cin) SMEM scalars.
    wdw = w_dw.reshape(cin, k * k)
    wpw = w_pw.reshape(cout, cin)

    kern = functools.partial(dilconv_kernel, ksize=k, dilation=dilation,
                             padding=padding, stride=stride, h1=h1, w1=w1)

    # Generation-aware VMEM budget with (8,128) tile padding accounted for:
    # double-buffered in/out blocks + padded-input scratch + live f32 slabs.
    itemsize = int(jnp.dtype(x.dtype).itemsize)
    need = (2 * _tile_padded_bytes((1, cin, h, w), itemsize)
            + 2 * _tile_padded_bytes((1, cout, ho, wo), 4)
            + _tile_padded_bytes((cin, hp, wp), itemsize)
            + (cin + cout) * _tile_padded_bytes((ho, wo), 4))
    try:
        vmem_cap = int(pltpu.get_tpu_info().vmem_capacity_bytes)
    except Exception:  # pragma: no cover - fall back to v7x-safe budget
        vmem_cap = 64 << 20
    vmem_bytes = int(min(max(2 * need + (4 << 20), 16 << 20),
                         (vmem_cap * 3) // 4))

    y = pl.pallas_call(
        kern,
        out_shape=jax.ShapeDtypeStruct((b, cout, ho, wo), jnp.float32),
        grid=(b,),
        in_specs=[
            pl.BlockSpec((1, cin, h, w), lambda i: (i, 0, 0, 0)),   # x, 1 batch
            pl.BlockSpec(memory_space=pltpu.MemorySpace.SMEM),      # dw weights
            pl.BlockSpec(memory_space=pltpu.MemorySpace.SMEM),      # pw weights
        ],
        out_specs=pl.BlockSpec((1, cout, ho, wo), lambda i: (i, 0, 0, 0)),
        scratch_shapes=[pltpu.VMEM((cin, hp, wp), x.dtype)],        # padded input
        compiler_params=pltpu.CompilerParams(
            dimension_semantics=("parallel",),
            vmem_limit_bytes=vmem_bytes),
    )(x, wdw, wpw)
    return y


def dilconv_reference(x, w_dw, w_pw, stride, padding, dilation):
    """Pure-JAX reference mirroring the PyTorch DilConv forward."""
    cin = x.shape[1]
    y = jax.lax.conv_general_dilated(
        x, w_dw, window_strides=(stride, stride),
        padding=((padding, padding), (padding, padding)),
        rhs_dilation=(dilation, dilation),
        dimension_numbers=('NCHW', 'OIHW', 'NCHW'),
        feature_group_count=cin,
        precision=jax.lax.Precision.HIGHEST)
    y = jax.lax.conv_general_dilated(
        y, w_pw, window_strides=(1, 1), padding=((0, 0), (0, 0)),
        dimension_numbers=('NCHW', 'OIHW', 'NCHW'),
        precision=jax.lax.Precision.HIGHEST)
    return y


if __name__ == "__main__":
    B, C_IN, C_OUT, H, W = 2, 4, 8, 16, 16
    K, STRIDE, PAD, DIL = 3, 1, 2, 2          # classic DilConv config

    key = jax.random.PRNGKey(0)
    kx_, k1, k2 = jax.random.split(key, 3)
    x = jax.random.normal(kx_, (B, C_IN, H, W), jnp.float32)
    # PyTorch shapes: depthwise (Cin, 1, K, K), pointwise (Cout, Cin, 1, 1)
    w_dw = 0.2 * jax.random.normal(k1, (C_IN, 1, K, K), jnp.float32)
    w_pw = 0.2 * jax.random.normal(k2, (C_OUT, C_IN, 1, 1), jnp.float32)

    out = dil_conv(x, w_dw, w_pw, kernel_size=K, stride=STRIDE,
                   padding=PAD, dilation=DIL)
    out = jax.block_until_ready(out)

    ref = dilconv_reference(x, w_dw, w_pw, STRIDE, PAD, DIL)
    np.testing.assert_allclose(np.asarray(out), np.asarray(ref),
                               rtol=1e-4, atol=1e-4)
    print("KERNEL_OK")
</pallas_src>

<mosaic_0001>
module attributes {stable_mosaic.version = 11 : i64} {
  func.func @dilconv_kernel(%arg0: i32, %arg1: memref<1x4x16x16xf32, #tpu.memory_space<vmem>>, %arg2: memref<4x9xf32, #tpu.memory_space<smem>>, %arg3: memref<8x4xf32, #tpu.memory_space<smem>>, %arg4: memref<1x8x16x16xf32, #tpu.memory_space<vmem>>, %arg5: memref<4x20x20xf32, #tpu.memory_space<vmem>>) attributes {dimension_semantics = [#tpu.dimension_semantics<parallel>], iteration_bounds = array<i64: 2>, scalar_prefetch = 0 : i64, scratch_operands = 1 : i64, tpu.core_type = #tpu.core_type<tc>, window_params = [{transform_indices = @transform_0, window_bounds = array<i64: 1, 4, 16, 16>}, {transform_indices = @transform_1, window_bounds = array<i64: 4, 9>}, {transform_indices = @transform_2, window_bounds = array<i64: 8, 4>}, {transform_indices = @transform_3, window_bounds = array<i64: 1, 8, 16, 16>}]} {
    %cst = arith.constant 0.000000e+00 : f32
    %0 = vector.broadcast %cst : f32 to vector<4x20x20xf32>
    %c0 = arith.constant 0 : index
    %c0_0 = arith.constant 0 : index
    %c0_1 = arith.constant 0 : index
    %1 = vector.load %arg5[%c0, %c0_0, %c0_1] : memref<4x20x20xf32, #tpu.memory_space<vmem>>, vector<4x20x20xf32>
    tpu.vector_store %arg5[%c0, %c0_0, %c0_1], %0 {strides = array<i32>} : memref<4x20x20xf32, #tpu.memory_space<vmem>>, vector<4x20x20xf32>,
    %c0_2 = arith.constant 0 : index
    %c0_3 = arith.constant 0 : index
    %c0_4 = arith.constant 0 : index
    %c0_5 = arith.constant 0 : index
    %2 = vector.load %arg1[%c0_2, %c0_3, %c0_4, %c0_5] : memref<1x4x16x16xf32, #tpu.memory_space<vmem>>, vector<1x4x16x16xf32>
    %3 = vector.shape_cast %2 : vector<1x4x16x16xf32> to vector<4x16x16xf32>
    %c0_6 = arith.constant 0 : index
    %c2 = arith.constant 2 : index
    %c2_7 = arith.constant 2 : index
    %4 = vector.load %arg5[%c0_6, %c2, %c2_7] : memref<4x20x20xf32, #tpu.memory_space<vmem>>, vector<4x16x16xf32>
    tpu.vector_store %arg5[%c0_6, %c2, %c2_7], %3 {strides = array<i32>} : memref<4x20x20xf32, #tpu.memory_space<vmem>>, vector<4x16x16xf32>,
    %c0_8 = arith.constant 0 : index
    %c0_9 = arith.constant 0 : index
    %c0_10 = arith.constant 0 : index
    %5 = vector.load %arg5[%c0_8, %c0_9, %c0_10] : memref<4x20x20xf32, #tpu.memory_space<vmem>>, vector<1x20x20xf32>
    %6 = vector.shape_cast %5 : vector<1x20x20xf32> to vector<20x20xf32>
    %7 = vector.extract_strided_slice %6 {offsets = [0, 0], sizes = [20, 16], strides = [1, 1]} : vector<20x20xf32> to vector<20x16xf32>
    %8 = vector.extract_strided_slice %6 {offsets = [0, 2], sizes = [20, 16], strides = [1, 1]} : vector<20x20xf32> to vector<20x16xf32>
    %9 = vector.extract_strided_slice %6 {offsets = [0, 4], sizes = [20, 16], strides = [1, 1]} : vector<20x20xf32> to vector<20x16xf32>
    %cst_11 = arith.constant 0.000000e+00 : f32
    %10 = vector.broadcast %cst_11 : f32 to vector<16x16xf32>
    %11 = vector.extract_strided_slice %7 {offsets = [0, 0], sizes = [16, 16], strides = [1, 1]} : vector<20x16xf32> to vector<16x16xf32>
    %c0_12 = arith.constant 0 : index
    %c0_13 = arith.constant 0 : index
    %12 = memref.load %arg2[%c0_12, %c0_13] : memref<4x9xf32, #tpu.memory_space<smem>>
    %13 = vector.broadcast %12 : f32 to vector<16x16xf32>
    %14 = arith.mulf %11, %13 : vector<16x16xf32>
    %15 = arith.addf %10, %14 : vector<16x16xf32>
    %16 = vector.extract_strided_slice %8 {offsets = [0, 0], sizes = [16, 16], strides = [1, 1]} : vector<20x16xf32> to vector<16x16xf32>
    %c0_14 = arith.constant 0 : index
    %c1 = arith.constant 1 : index
    %17 = memref.load %arg2[%c0_14, %c1] : memref<4x9xf32, #tpu.memory_space<smem>>
    %18 = vector.broadcast %17 : f32 to vector<16x16xf32>
    %19 = arith.mulf %16, %18 : vector<16x16xf32>
    %20 = arith.addf %15, %19 : vector<16x16xf32>
    %21 = vector.extract_strided_slice %9 {offsets = [0, 0], sizes = [16, 16], strides = [1, 1]} : vector<20x16xf32> to vector<16x16xf32>
    %c0_15 = arith.constant 0 : index
    %c2_16 = arith.constant 2 : index
    %22 = memref.load %arg2[%c0_15, %c2_16] : memref<4x9xf32, #tpu.memory_space<smem>>
    %23 = vector.broadcast %22 : f32 to vector<16x16xf32>
    %24 = arith.mulf %21, %23 : vector<16x16xf32>
    %25 = arith.addf %20, %24 : vector<16x16xf32>
    %26 = vector.extract_strided_slice %7 {offsets = [2, 0], sizes = [16, 16], strides = [1, 1]} : vector<20x16xf32> to vector<16x16xf32>
    %c0_17 = arith.constant 0 : index
    %c3 = arith.constant 3 : index
    %27 = memref.load %arg2[%c0_17, %c3] : memref<4x9xf32, #tpu.memory_space<smem>>
    %28 = vector.broadcast %27 : f32 to vector<16x16xf32>
    %29 = arith.mulf %26, %28 : vector<16x16xf32>
    %30 = arith.addf %25, %29 : vector<16x16xf32>
    %31 = vector.extract_strided_slice %8 {offsets = [2, 0], sizes = [16, 16], strides = [1, 1]} : vector<20x16xf32> to vector<16x16xf32>
    %c0_18 = arith.constant 0 : index
    %c4 = arith.constant 4 : index
    %32 = memref.load %arg2[%c0_18, %c4] : memref<4x9xf32, #tpu.memory_space<smem>>
    %33 = vector.broadcast %32 : f32 to vector<16x16xf32>
    %34 = arith.mulf %31, %33 : vector<16x16xf32>
    %35 = arith.addf %30, %34 : vector<16x16xf32>
    %36 = vector.extract_strided_slice %9 {offsets = [2, 0], sizes = [16, 16], strides = [1, 1]} : vector<20x16xf32> to vector<16x16xf32>
    %c0_19 = arith.constant 0 : index
    %c5 = arith.constant 5 : index
    %37 = memref.load %arg2[%c0_19, %c5] : memref<4x9xf32, #tpu.memory_space<smem>>
    %38 = vector.broadcast %37 : f32 to vector<16x16xf32>
    %39 = arith.mulf %36, %38 : vector<16x16xf32>
    %40 = arith.addf %35, %39 : vector<16x16xf32>
    %41 = vector.extract_strided_slice %7 {offsets = [4, 0], sizes = [16, 16], strides = [1, 1]} : vector<20x16xf32> to vector<16x16xf32>
    %c0_20 = arith.constant 0 : index
    %c6 = arith.constant 6 : index
    %42 = memref.load %arg2[%c0_20, %c6] : memref<4x9xf32, #tpu.memory_space<smem>>
    %43 = vector.broadcast %42 : f32 to vector<16x16xf32>
    %44 = arith.mulf %41, %43 : vector<16x16xf32>
    %45 = arith.addf %40, %44 : vector<16x16xf32>
    %46 = vector.extract_strided_slice %8 {offsets = [4, 0], sizes = [16, 16], strides = [1, 1]} : vector<20x16xf32> to vector<16x16xf32>
    %c0_21 = arith.constant 0 : index
    %c7 = arith.constant 7 : index
    %47 = memref.load %arg2[%c0_21, %c7] : memref<4x9xf32, #tpu.memory_space<smem>>
    %48 = vector.broadcast %47 : f32 to vector<16x16xf32>
    %49 = arith.mulf %46, %48 : vector<16x16xf32>
    %50 = arith.addf %45, %49 : vector<16x16xf32>
    %51 = vector.extract_strided_slice %9 {offsets = [4, 0], sizes = [16, 16], strides = [1, 1]} : vector<20x16xf32> to vector<16x16xf32>
    %c0_22 = arith.constant 0 : index
    %c8 = arith.constant 8 : index
    %52 = memref.load %arg2[%c0_22, %c8] : memref<4x9xf32, #tpu.memory_space<smem>>
    %53 = vector.broadcast %52 : f32 to vector<16x16xf32>
    %54 = arith.mulf %51, %53 : vector<16x16xf32>
    %55 = arith.addf %50, %54 : vector<16x16xf32>
    %c1_23 = arith.constant 1 : index
    %c0_24 = arith.constant 0 : index
    %c0_25 = arith.constant 0 : index
    %56 = vector.load %arg5[%c1_23, %c0_24, %c0_25] : memref<4x20x20xf32, #tpu.memory_space<vmem>>, vector<1x20x20xf32>
    %57 = vector.shape_cast %56 : vector<1x20x20xf32> to vector<20x20xf32>
    %58 = vector.extract_strided_slice %57 {offsets = [0, 0], sizes = [20, 16], strides = [1, 1]} : vector<20x20xf32> to vector<20x16xf32>
    %59 = vector.extract_strided_slice %57 {offsets = [0, 2], sizes = [20, 16], strides = [1, 1]} : vector<20x20xf32> to vector<20x16xf32>
    %60 = vector.extract_strided_slice %57 {offsets = [0, 4], sizes = [20, 16], strides = [1, 1]} : vector<20x20xf32> to vector<20x16xf32>
    %cst_26 = arith.constant 0.000000e+00 : f32
    %61 = vector.broadcast %cst_26 : f32 to vector<16x16xf32>
    %62 = vector.extract_strided_slice %58 {offsets = [0, 0], sizes = [16, 16], strides = [1, 1]} : vector<20x16xf32> to vector<16x16xf32>
    %c1_27 = arith.constant 1 : index
    %c0_28 = arith.constant 0 : index
    %63 = memref.load %arg2[%c1_27, %c0_28] : memref<4x9xf32, #tpu.memory_space<smem>>
    %64 = vector.broadcast %63 : f32 to vector<16x16xf32>
    %65 = arith.mulf %62, %64 : vector<16x16xf32>
    %66 = arith.addf %61, %65 : vector<16x16xf32>
    %67 = vector.extract_strided_slice %59 {offsets = [0, 0], sizes = [16, 16], strides = [1, 1]} : vector<20x16xf32> to vector<16x16xf32>
    %c1_29 = arith.constant 1 : index
    %c1_30 = arith.constant 1 : index
    %68 = memref.load %arg2[%c1_29, %c1_30] : memref<4x9xf32, #tpu.memory_space<smem>>
    %69 = vector.broadcast %68 : f32 to vector<16x16xf32>
    %70 = arith.mulf %67, %69 : vector<16x16xf32>
    %71 = arith.addf %66, %70 : vector<16x16xf32>
    %72 = vector.extract_strided_slice %60 {offsets = [0, 0], sizes = [16, 16], strides = [1, 1]} : vector<20x16xf32> to vector<16x16xf32>
    %c1_31 = arith.constant 1 : index
    %c2_32 = arith.constant 2 : index
    %73 = memref.load %arg2[%c1_31, %c2_32] : memref<4x9xf32, #tpu.memory_space<smem>>
    %74 = vector.broadcast %73 : f32 to vector<16x16xf32>
    %75 = arith.mulf %72, %74 : vector<16x16xf32>
    %76 = arith.addf %71, %75 : vector<16x16xf32>
    %77 = vector.extract_strided_slice %58 {offsets = [2, 0], sizes = [16, 16], strides = [1, 1]} : vector<20x16xf32> to vector<16x16xf32>
    %c1_33 = arith.constant 1 : index
    %c3_34 = arith.constant 3 : index
    %78 = memref.load %arg2[%c1_33, %c3_34] : memref<4x9xf32, #tpu.memory_space<smem>>
    %79 = vector.broadcast %78 : f32 to vector<16x16xf32>
    %80 = arith.mulf %77, %79 : vector<16x16xf32>
    %81 = arith.addf %76, %80 : vector<16x16xf32>
    %82 = vector.extract_strided_slice %59 {offsets = [2, 0], sizes = [16, 16], strides = [1, 1]} : vector<20x16xf32> to vector<16x16xf32>
    %c1_35 = arith.constant 1 : index
    %c4_36 = arith.constant 4 : index
    %83 = memref.load %arg2[%c1_35, %c4_36] : memref<4x9xf32, #tpu.memory_space<smem>>
    %84 = vector.broadcast %83 : f32 to vector<16x16xf32>
    %85 = arith.mulf %82, %84 : vector<16x16xf32>
    %86 = arith.addf %81, %85 : vector<16x16xf32>
    %87 = vector.extract_strided_slice %60 {offsets = [2, 0], sizes = [16, 16], strides = [1, 1]} : vector<20x16xf32> to vector<16x16xf32>
    %c1_37 = arith.constant 1 : index
    %c5_38 = arith.constant 5 : index
    %88 = memref.load %arg2[%c1_37, %c5_38] : memref<4x9xf32, #tpu.memory_space<smem>>
    %89 = vector.broadcast %88 : f32 to vector<16x16xf32>
    %90 = arith.mulf %87, %89 : vector<16x16xf32>
    %91 = arith.addf %86, %90 : vector<16x16xf32>
    %92 = vector.extract_strided_slice %58 {offsets = [4, 0], sizes = [16, 16], strides = [1, 1]} : vector<20x16xf32> to vector<16x16xf32>
    %c1_39 = arith.constant 1 : index
    %c6_40 = arith.constant 6 : index
    %93 = memref.load %arg2[%c1_39, %c6_40] : memref<4x9xf32, #tpu.memory_space<smem>>
    %94 = vector.broadcast %93 : f32 to vector<16x16xf32>
    %95 = arith.mulf %92, %94 : vector<16x16xf32>
    %96 = arith.addf %91, %95 : vector<16x16xf32>
    %97 = vector.extract_strided_slice %59 {offsets = [4, 0], sizes = [16, 16], strides = [1, 1]} : vector<20x16xf32> to vector<16x16xf32>
    %c1_41 = arith.constant 1 : index
    %c7_42 = arith.constant 7 : index
    %98 = memref.load %arg2[%c1_41, %c7_42] : memref<4x9xf32, #tpu.memory_space<smem>>
    %99 = vector.broadcast %98 : f32 to vector<16x16xf32>
    %100 = arith.mulf %97, %99 : vector<16x16xf32>
    %101 = arith.addf %96, %100 : vector<16x16xf32>
    %102 = vector.extract_strided_slice %60 {offsets = [4, 0], sizes = [16, 16], strides = [1, 1]} : vector<20x16xf32> to vector<16x16xf32>
    %c1_43 = arith.constant 1 : index
    %c8_44 = arith.constant 8 : index
    %103 = memref.load %arg2[%c1_43, %c8_44] : memref<4x9xf32, #tpu.memory_space<smem>>
    %104 = vector.broadcast %103 : f32 to vector<16x16xf32>
    %105 = arith.mulf %102, %104 : vector<16x16xf32>
    %106 = arith.addf %101, %105 : vector<16x16xf32>
    %c2_45 = arith.constant 2 : index
    %c0_46 = arith.constant 0 : index
    %c0_47 = arith.constant 0 : index
    %107 = vector.load %arg5[%c2_45, %c0_46, %c0_47] : memref<4x20x20xf32, #tpu.memory_space<vmem>>, vector<1x20x20xf32>
    %108 = vector.shape_cast %107 : vector<1x20x20xf32> to vector<20x20xf32>
    %109 = vector.extract_strided_slice %108 {offsets = [0, 0], sizes = [20, 16], strides = [1, 1]} : vector<20x20xf32> to vector<20x16xf32>
    %110 = vector.extract_strided_slice %108 {offsets = [0, 2], sizes = [20, 16], strides = [1, 1]} : vector<20x20xf32> to vector<20x16xf32>
    %111 = vector.extract_strided_slice %108 {offsets = [0, 4], sizes = [20, 16], strides = [1, 1]} : vector<20x20xf32> to vector<20x16xf32>
    %cst_48 = arith.constant 0.000000e+00 : f32
    %112 = vector.broadcast %cst_48 : f32 to vector<16x16xf32>
    %113 = vector.extract_strided_slice %109 {offsets = [0, 0], sizes = [16, 16], strides = [1, 1]} : vector<20x16xf32> to vector<16x16xf32>
    %c2_49 = arith.constant 2 : index
    %c0_50 = arith.constant 0 : index
    %114 = memref.load %arg2[%c2_49, %c0_50] : memref<4x9xf32, #tpu.memory_space<smem>>
    %115 = vector.broadcast %114 : f32 to vector<16x16xf32>
    %116 = arith.mulf %113, %115 : vector<16x16xf32>
    %117 = arith.addf %112, %116 : vector<16x16xf32>
    %118 = vector.extract_strided_slice %110 {offsets = [0, 0], sizes = [16, 16], strides = [1, 1]} : vector<20x16xf32> to vector<16x16xf32>
    %c2_51 = arith.constant 2 : index
    %c1_52 = arith.constant 1 : index
    %119 = memref.load %arg2[%c2_51, %c1_52] : memref<4x9xf32, #tpu.memory_space<smem>>
    %120 = vector.broadcast %119 : f32 to vector<16x16xf32>
    %121 = arith.mulf %118, %120 : vector<16x16xf32>
    %122 = arith.addf %117, %121 : vector<16x16xf32>
    %123 = vector.extract_strided_slice %111 {offsets = [0, 0], sizes = [16, 16], strides = [1, 1]} : vector<20x16xf32> to vector<16x16xf32>
    %c2_53 = arith.constant 2 : index
    %c2_54 = arith.constant 2 : index
    %124 = memref.load %arg2[%c2_53, %c2_54] : memref<4x9xf32, #tpu.memory_space<smem>>
    %125 = vector.broadcast %124 : f32 to vector<16x16xf32>
    %126 = arith.mulf %123, %125 : vector<16x16xf32>
    %127 = arith.addf %122, %126 : vector<16x16xf32>
    %128 = vector.extract_strided_slice %109 {offsets = [2, 0], sizes = [16, 16], strides = [1, 1]} : vector<20x16xf32> to vector<16x16xf32>
    %c2_55 = arith.constant 2 : index
    %c3_56 = arith.constant 3 : index
    %129 = memref.load %arg2[%c2_55, %c3_56] : memref<4x9xf32, #tpu.memory_space<smem>>
    %130 = vector.broadcast %129 : f32 to vector<16x16xf32>
    %131 = arith.mulf %128, %130 : vector<16x16xf32>
    %132 = arith.addf %127, %131 : vector<16x16xf32>
    %133 = vector.extract_strided_slice %110 {offsets = [2, 0], sizes = [16, 16], strides = [1, 1]} : vector<20x16xf32> to vector<16x16xf32>
    %c2_57 = arith.constant 2 : index
    %c4_58 = arith.constant 4 : index
    %134 = memref.load %arg2[%c2_57, %c4_58] : memref<4x9xf32, #tpu.memory_space<smem>>
    %135 = vector.broadcast %134 : f32 to vector<16x16xf32>
    %136 = arith.mulf %133, %135 : vector<16x16xf32>
    %137 = arith.addf %132, %136 : vector<16x16xf32>
    %138 = vector.extract_strided_slice %111 {offsets = [2, 0], sizes = [16, 16], strides = [1, 1]} : vector<20x16xf32> to vector<16x16xf32>
    %c2_59 = arith.constant 2 : index
    %c5_60 = arith.constant 5 : index
    %139 = memref.load %arg2[%c2_59, %c5_60] : memref<4x9xf32, #tpu.memory_space<smem>>
    %140 = vector.broadcast %139 : f32 to vector<16x16xf32>
    %141 = arith.mulf %138, %140 : vector<16x16xf32>
    %142 = arith.addf %137, %141 : vector<16x16xf32>
    %143 = vector.extract_strided_slice %109 {offsets = [4, 0], sizes = [16, 16], strides = [1, 1]} : vector<20x16xf32> to vector<16x16xf32>
    %c2_61 = arith.constant 2 : index
    %c6_62 = arith.constant 6 : index
    %144 = memref.load %arg2[%c2_61, %c6_62] : memref<4x9xf32, #tpu.memory_space<smem>>
    %145 = vector.broadcast %144 : f32 to vector<16x16xf32>
    %146 = arith.mulf %143, %145 : vector<16x16xf32>
    %147 = arith.addf %142, %146 : vector<16x16xf32>
    %148 = vector.extract_strided_slice %110 {offsets = [4, 0], sizes = [16, 16], strides = [1, 1]} : vector<20x16xf32> to vector<16x16xf32>
    %c2_63 = arith.constant 2 : index
    %c7_64 = arith.constant 7 : index
    %149 = memref.load %arg2[%c2_63, %c7_64] : memref<4x9xf32, #tpu.memory_space<smem>>
    %150 = vector.broadcast %149 : f32 to vector<16x16xf32>
    %151 = arith.mulf %148, %150 : vector<16x16xf32>
    %152 = arith.addf %147, %151 : vector<16x16xf32>
    %153 = vector.extract_strided_slice %111 {offsets = [4, 0], sizes = [16, 16], strides = [1, 1]} : vector<20x16xf32> to vector<16x16xf32>
    %c2_65 = arith.constant 2 : index
    %c8_66 = arith.constant 8 : index
    %154 = memref.load %arg2[%c2_65, %c8_66] : memref<4x9xf32, #tpu.memory_space<smem>>
    %155 = vector.broadcast %154 : f32 to vector<16x16xf32>
    %156 = arith.mulf %153, %155 : vector<16x16xf32>
    %157 = arith.addf %152, %156 : vector<16x16xf32>
    %c3_67 = arith.constant 3 : index
    %c0_68 = arith.constant 0 : index
    %c0_69 = arith.constant 0 : index
    %158 = vector.load %arg5[%c3_67, %c0_68, %c0_69] : memref<4x20x20xf32, #tpu.memory_space<vmem>>, vector<1x20x20xf32>
    %159 = vector.shape_cast %158 : vector<1x20x20xf32> to vector<20x20xf32>
    %160 = vector.extract_strided_slice %159 {offsets = [0, 0], sizes = [20, 16], strides = [1, 1]} : vector<20x20xf32> to vector<20x16xf32>
    %161 = vector.extract_strided_slice %159 {offsets = [0, 2], sizes = [20, 16], strides = [1, 1]} : vector<20x20xf32> to vector<20x16xf32>
    %162 = vector.extract_strided_slice %159 {offsets = [0, 4], sizes = [20, 16], strides = [1, 1]} : vector<20x20xf32> to vector<20x16xf32>
    %cst_70 = arith.constant 0.000000e+00 : f32
    %163 = vector.broadcast %cst_70 : f32 to vector<16x16xf32>
    %164 = vector.extract_strided_slice %160 {offsets = [0, 0], sizes = [16, 16], strides = [1, 1]} : vector<20x16xf32> to vector<16x16xf32>
    %c3_71 = arith.constant 3 : index
    %c0_72 = arith.constant 0 : index
    %165 = memref.load %arg2[%c3_71, %c0_72] : memref<4x9xf32, #tpu.memory_space<smem>>
    %166 = vector.broadcast %165 : f32 to vector<16x16xf32>
    %167 = arith.mulf %164, %166 : vector<16x16xf32>
    %168 = arith.addf %163, %167 : vector<16x16xf32>
    %169 = vector.extract_strided_slice %161 {offsets = [0, 0], sizes = [16, 16], strides = [1, 1]} : vector<20x16xf32> to vector<16x16xf32>
    %c3_73 = arith.constant 3 : index
    %c1_74 = arith.constant 1 : index
    %170 = memref.load %arg2[%c3_73, %c1_74] : memref<4x9xf32, #tpu.memory_space<smem>>
    %171 = vector.broadcast %170 : f32 to vector<16x16xf32>
    %172 = arith.mulf %169, %171 : vector<16x16xf32>
    %173 = arith.addf %168, %172 : vector<16x16xf32>
    %174 = vector.extract_strided_slice %162 {offsets = [0, 0], sizes = [16, 16], strides = [1, 1]} : vector<20x16xf32> to vector<16x16xf32>
    %c3_75 = arith.constant 3 : index
    %c2_76 = arith.constant 2 : index
    %175 = memref.load %arg2[%c3_75, %c2_76] : memref<4x9xf32, #tpu.memory_space<smem>>
    %176 = vector.broadcast %175 : f32 to vector<16x16xf32>
    %177 = arith.mulf %174, %176 : vector<16x16xf32>
    %178 = arith.addf %173, %177 : vector<16x16xf32>
    %179 = vector.extract_strided_slice %160 {offsets = [2, 0], sizes = [16, 16], strides = [1, 1]} : vector<20x16xf32> to vector<16x16xf32>
    %c3_77 = arith.constant 3 : index
    %c3_78 = arith.constant 3 : index
    %180 = memref.load %arg2[%c3_77, %c3_78] : memref<4x9xf32, #tpu.memory_space<smem>>
    %181 = vector.broadcast %180 : f32 to vector<16x16xf32>
    %182 = arith.mulf %179, %181 : vector<16x16xf32>
    %183 = arith.addf %178, %182 : vector<16x16xf32>
    %184 = vector.extract_strided_slice %161 {offsets = [2, 0], sizes = [16, 16], strides = [1, 1]} : vector<20x16xf32> to vector<16x16xf32>
    %c3_79 = arith.constant 3 : index
    %c4_80 = arith.constant 4 : index
    %185 = memref.load %arg2[%c3_79, %c4_80] : memref<4x9xf32, #tpu.memory_space<smem>>
    %186 = vector.broadcast %185 : f32 to vector<16x16xf32>
    %187 = arith.mulf %184, %186 : vector<16x16xf32>
    %188 = arith.addf %183, %187 : vector<16x16xf32>
    %189 = vector.extract_strided_slice %162 {offsets = [2, 0], sizes = [16, 16], strides = [1, 1]} : vector<20x16xf32> to vector<16x16xf32>
    %c3_81 = arith.constant 3 : index
    %c5_82 = arith.constant 5 : index
    %190 = memref.load %arg2[%c3_81, %c5_82] : memref<4x9xf32, #tpu.memory_space<smem>>
    %191 = vector.broadcast %190 : f32 to vector<16x16xf32>
    %192 = arith.mulf %189, %191 : vector<16x16xf32>
    %193 = arith.addf %188, %192 : vector<16x16xf32>
    %194 = vector.extract_strided_slice %160 {offsets = [4, 0], sizes = [16, 16], strides = [1, 1]} : vector<20x16xf32> to vector<16x16xf32>
    %c3_83 = arith.constant 3 : index
    %c6_84 = arith.constant 6 : index
    %195 = memref.load %arg2[%c3_83, %c6_84] : memref<4x9xf32, #tpu.memory_space<smem>>
    %196 = vector.broadcast %195 : f32 to vector<16x16xf32>
    %197 = arith.mulf %194, %196 : vector<16x16xf32>
    %198 = arith.addf %193, %197 : vector<16x16xf32>
    %199 = vector.extract_strided_slice %161 {offsets = [4, 0], sizes = [16, 16], strides = [1, 1]} : vector<20x16xf32> to vector<16x16xf32>
    %c3_85 = arith.constant 3 : index
    %c7_86 = arith.constant 7 : index
    %200 = memref.load %arg2[%c3_85, %c7_86] : memref<4x9xf32, #tpu.memory_space<smem>>
    %201 = vector.broadcast %200 : f32 to vector<16x16xf32>
    %202 = arith.mulf %199, %201 : vector<16x16xf32>
    %203 = arith.addf %198, %202 : vector<16x16xf32>
    %204 = vector.extract_strided_slice %162 {offsets = [4, 0], sizes = [16, 16], strides = [1, 1]} : vector<20x16xf32> to vector<16x16xf32>
    %c3_87 = arith.constant 3 : index
    %c8_88 = arith.constant 8 : index
    %205 = memref.load %arg2[%c3_87, %c8_88] : memref<4x9xf32, #tpu.memory_space<smem>>
    %206 = vector.broadcast %205 : f32 to vector<16x16xf32>
    %207 = arith.mulf %204, %206 : vector<16x16xf32>
    %208 = arith.addf %203, %207 : vector<16x16xf32>
    %c0_89 = arith.constant 0 : index
    %c0_90 = arith.constant 0 : index
    %209 = memref.load %arg3[%c0_89, %c0_90] : memref<8x4xf32, #tpu.memory_space<smem>>
    %210 = vector.broadcast %209 : f32 to vector<16x16xf32>
    %211 = arith.mulf %55, %210 : vector<16x16xf32>
    %c0_91 = arith.constant 0 : index
    %c1_92 = arith.constant 1 : index
    %212 = memref.load %arg3[%c0_91, %c1_92] : memref<8x4xf32, #tpu.memory_space<smem>>
    %213 = vector.broadcast %212 : f32 to vector<16x16xf32>
    %214 = arith.mulf %106, %213 : vector<16x16xf32>
    %215 = arith.addf %211, %214 : vector<16x16xf32>
    %c0_93 = arith.constant 0 : index
    %c2_94 = arith.constant 2 : index
    %216 = memref.load %arg3[%c0_93, %c2_94] : memref<8x4xf32, #tpu.memory_space<smem>>
    %217 = vector.broadcast %216 : f32 to vector<16x16xf32>
    %218 = arith.mulf %157, %217 : vector<16x16xf32>
    %219 = arith.addf %215, %218 : vector<16x16xf32>
    %c0_95 = arith.constant 0 : index
    %c3_96 = arith.constant 3 : index
    %220 = memref.load %arg3[%c0_95, %c3_96] : memref<8x4xf32, #tpu.memory_space<smem>>
    %221 = vector.broadcast %220 : f32 to vector<16x16xf32>
    %222 = arith.mulf %208, %221 : vector<16x16xf32>
    %223 = arith.addf %219, %222 : vector<16x16xf32>
    %c0_97 = arith.constant 0 : index
    %c0_98 = arith.constant 0 : index
    %c0_99 = arith.constant 0 : index
    %c0_100 = arith.constant 0 : index
    %224 = vector.load %arg4[%c0_97, %c0_98, %c0_99, %c0_100] : memref<1x8x16x16xf32, #tpu.memory_space<vmem>>, vector<1x1x16x16xf32>
    %225 = vector.shape_cast %224 : vector<1x1x16x16xf32> to vector<16x16xf32>
    %226 = vector.shape_cast %223 : vector<16x16xf32> to vector<1x1x16x16xf32>
    tpu.vector_store %arg4[%c0_97, %c0_98, %c0_99, %c0_100], %226 {strides = array<i32>} : memref<1x8x16x16xf32, #tpu.memory_space<vmem>>, vector<1x1x16x16xf32>,
    %c1_101 = arith.constant 1 : index
    %c0_102 = arith.constant 0 : index
    %227 = memref.load %arg3[%c1_101, %c0_102] : memref<8x4xf32, #tpu.memory_space<smem>>
    %228 = vector.broadcast %227 : f32 to vector<16x16xf32>
    %229 = arith.mulf %55, %228 : vector<16x16xf32>
    %c1_103 = arith.constant 1 : index
    %c1_104 = arith.constant 1 : index
    %230 = memref.load %arg3[%c1_103, %c1_104] : memref<8x4xf32, #tpu.memory_space<smem>>
    %231 = vector.broadcast %230 : f32 to vector<16x16xf32>
    %232 = arith.mulf %106, %231 : vector<16x16xf32>
    %233 = arith.addf %229, %232 : vector<16x16xf32>
    %c1_105 = arith.constant 1 : index
    %c2_106 = arith.constant 2 : index
    %234 = memref.load %arg3[%c1_105, %c2_106] : memref<8x4xf32, #tpu.memory_space<smem>>
    %235 = vector.broadcast %234 : f32 to vector<16x16xf32>
    %236 = arith.mulf %157, %235 : vector<16x16xf32>
    %237 = arith.addf %233, %236 : vector<16x16xf32>
    %c1_107 = arith.constant 1 : index
    %c3_108 = arith.constant 3 : index
    %238 = memref.load %arg3[%c1_107, %c3_108] : memref<8x4xf32, #tpu.memory_space<smem>>
    %239 = vector.broadcast %238 : f32 to vector<16x16xf32>
    %240 = arith.mulf %208, %239 : vector<16x16xf32>
    %241 = arith.addf %237, %240 : vector<16x16xf32>
    %c0_109 = arith.constant 0 : index
    %c1_110 = arith.constant 1 : index
    %c0_111 = arith.constant 0 : index
    %c0_112 = arith.constant 0 : index
    %242 = vector.load %arg4[%c0_109, %c1_110, %c0_111, %c0_112] : memref<1x8x16x16xf32, #tpu.memory_space<vmem>>, vector<1x1x16x16xf32>
    %243 = vector.shape_cast %242 : vector<1x1x16x16xf32> to vector<16x16xf32>
    %244 = vector.shape_cast %241 : vector<16x16xf32> to vector<1x1x16x16xf32>
    tpu.vector_store %arg4[%c0_109, %c1_110, %c0_111, %c0_112], %244 {strides = array<i32>} : memref<1x8x16x16xf32, #tpu.memory_space<vmem>>, vector<1x1x16x16xf32>,
    %c2_113 = arith.constant 2 : index
    %c0_114 = arith.constant 0 : index
    %245 = memref.load %arg3[%c2_113, %c0_114] : memref<8x4xf32, #tpu.memory_space<smem>>
    %246 = vector.broadcast %245 : f32 to vector<16x16xf32>
    %247 = arith.mulf %55, %246 : vector<16x16xf32>
    %c2_115 = arith.constant 2 : index
    %c1_116 = arith.constant 1 : index
    %248 = memref.load %arg3[%c2_115, %c1_116] : memref<8x4xf32, #tpu.memory_space<smem>>
    %249 = vector.broadcast %248 : f32 to vector<16x16xf32>
    %250 = arith.mulf %106, %249 : vector<16x16xf32>
    %251 = arith.addf %247, %250 : vector<16x16xf32>
    %c2_117 = arith.constant 2 : index
    %c2_118 = arith.constant 2 : index
    %252 = memref.load %arg3[%c2_117, %c2_118] : memref<8x4xf32, #tpu.memory_space<smem>>
    %253 = vector.broadcast %252 : f32 to vector<16x16xf32>
    %254 = arith.mulf %157, %253 : vector<16x16xf32>
    %255 = arith.addf %251, %254 : vector<16x16xf32>
    %c2_119 = arith.constant 2 : index
    %c3_120 = arith.constant 3 : index
    %256 = memref.load %arg3[%c2_119, %c3_120] : memref<8x4xf32, #tpu.memory_space<smem>>
    %257 = vector.broadcast %256 : f32 to vector<16x16xf32>
    %258 = arith.mulf %208, %257 : vector<16x16xf32>
    %259 = arith.addf %255, %258 : vector<16x16xf32>
    %c0_121 = arith.constant 0 : index
    %c2_122 = arith.constant 2 : index
    %c0_123 = arith.constant 0 : index
    %c0_124 = arith.constant 0 : index
    %260 = vector.load %arg4[%c0_121, %c2_122, %c0_123, %c0_124] : memref<1x8x16x16xf32, #tpu.memory_space<vmem>>, vector<1x1x16x16xf32>
    %261 = vector.shape_cast %260 : vector<1x1x16x16xf32> to vector<16x16xf32>
    %262 = vector.shape_cast %259 : vector<16x16xf32> to vector<1x1x16x16xf32>
    tpu.vector_store %arg4[%c0_121, %c2_122, %c0_123, %c0_124], %262 {strides = array<i32>} : memref<1x8x16x16xf32, #tpu.memory_space<vmem>>, vector<1x1x16x16xf32>,
    %c3_125 = arith.constant 3 : index
    %c0_126 = arith.constant 0 : index
    %263 = memref.load %arg3[%c3_125, %c0_126] : memref<8x4xf32, #tpu.memory_space<smem>>
    %264 = vector.broadcast %263 : f32 to vector<16x16xf32>
    %265 = arith.mulf %55, %264 : vector<16x16xf32>
    %c3_127 = arith.constant 3 : index
    %c1_128 = arith.constant 1 : index
    %266 = memref.load %arg3[%c3_127, %c1_128] : memref<8x4xf32, #tpu.memory_space<smem>>
    %267 = vector.broadcast %266 : f32 to vector<16x16xf32>
    %268 = arith.mulf %106, %267 : vector<16x16xf32>
    %269 = arith.addf %265, %268 : vector<16x16xf32>
    %c3_129 = arith.constant 3 : index
    %c2_130 = arith.constant 2 : index
    %270 = memref.load %arg3[%c3_129, %c2_130] : memref<8x4xf32, #tpu.memory_space<smem>>
    %271 = vector.broadcast %270 : f32 to vector<16x16xf32>
    %272 = arith.mulf %157, %271 : vector<16x16xf32>
    %273 = arith.addf %269, %272 : vector<16x16xf32>
    %c3_131 = arith.constant 3 : index
    %c3_132 = arith.constant 3 : index
    %274 = memref.load %arg3[%c3_131, %c3_132] : memref<8x4xf32, #tpu.memory_space<smem>>
    %275 = vector.broadcast %274 : f32 to vector<16x16xf32>
    %276 = arith.mulf %208, %275 : vector<16x16xf32>
    %277 = arith.addf %273, %276 : vector<16x16xf32>
    %c0_133 = arith.constant 0 : index
    %c3_134 = arith.constant 3 : index
    %c0_135 = arith.constant 0 : index
    %c0_136 = arith.constant 0 : index
    %278 = vector.load %arg4[%c0_133, %c3_134, %c0_135, %c0_136] : memref<1x8x16x16xf32, #tpu.memory_space<vmem>>, vector<1x1x16x16xf32>
    %279 = vector.shape_cast %278 : vector<1x1x16x16xf32> to vector<16x16xf32>
    %280 = vector.shape_cast %277 : vector<16x16xf32> to vector<1x1x16x16xf32>
    tpu.vector_store %arg4[%c0_133, %c3_134, %c0_135, %c0_136], %280 {strides = array<i32>} : memref<1x8x16x16xf32, #tpu.memory_space<vmem>>, vector<1x1x16x16xf32>,
    %c4_137 = arith.constant 4 : index
    %c0_138 = arith.constant 0 : index
    %281 = memref.load %arg3[%c4_137, %c0_138] : memref<8x4xf32, #tpu.memory_space<smem>>
    %282 = vector.broadcast %281 : f32 to vector<16x16xf32>
    %283 = arith.mulf %55, %282 : vector<16x16xf32>
    %c4_139 = arith.constant 4 : index
    %c1_140 = arith.constant 1 : index
    %284 = memref.load %arg3[%c4_139, %c1_140] : memref<8x4xf32, #tpu.memory_space<smem>>
    %285 = vector.broadcast %284 : f32 to vector<16x16xf32>
    %286 = arith.mulf %106, %285 : vector<16x16xf32>
    %287 = arith.addf %283, %286 : vector<16x16xf32>
    %c4_141 = arith.constant 4 : index
    %c2_142 = arith.constant 2 : index
    %288 = memref.load %arg3[%c4_141, %c2_142] : memref<8x4xf32, #tpu.memory_space<smem>>
    %289 = vector.broadcast %288 : f32 to vector<16x16xf32>
    %290 = arith.mulf %157, %289 : vector<16x16xf32>
    %291 = arith.addf %287, %290 : vector<16x16xf32>
    %c4_143 = arith.constant 4 : index
    %c3_144 = arith.constant 3 : index
    %292 = memref.load %arg3[%c4_143, %c3_144] : memref<8x4xf32, #tpu.memory_space<smem>>
    %293 = vector.broadcast %292 : f32 to vector<16x16xf32>
    %294 = arith.mulf %208, %293 : vector<16x16xf32>
    %295 = arith.addf %291, %294 : vector<16x16xf32>
    %c0_145 = arith.constant 0 : index
    %c4_146 = arith.constant 4 : index
    %c0_147 = arith.constant 0 : index
    %c0_148 = arith.constant 0 : index
    %296 = vector.load %arg4[%c0_145, %c4_146, %c0_147, %c0_148] : memref<1x8x16x16xf32, #tpu.memory_space<vmem>>, vector<1x1x16x16xf32>
    %297 = vector.shape_cast %296 : vector<1x1x16x16xf32> to vector<16x16xf32>
    %298 = vector.shape_cast %295 : vector<16x16xf32> to vector<1x1x16x16xf32>
    tpu.vector_store %arg4[%c0_145, %c4_146, %c0_147, %c0_148], %298 {strides = array<i32>} : memref<1x8x16x16xf32, #tpu.memory_space<vmem>>, vector<1x1x16x16xf32>,
    %c5_149 = arith.constant 5 : index
    %c0_150 = arith.constant 0 : index
    %299 = memref.load %arg3[%c5_149, %c0_150] : memref<8x4xf32, #tpu.memory_space<smem>>
    %300 = vector.broadcast %299 : f32 to vector<16x16xf32>
    %301 = arith.mulf %55, %300 : vector<16x16xf32>
    %c5_151 = arith.constant 5 : index
    %c1_152 = arith.constant 1 : index
    %302 = memref.load %arg3[%c5_151, %c1_152] : memref<8x4xf32, #tpu.memory_space<smem>>
    %303 = vector.broadcast %302 : f32 to vector<16x16xf32>
    %304 = arith.mulf %106, %303 : vector<16x16xf32>
    %305 = arith.addf %301, %304 : vector<16x16xf32>
    %c5_153 = arith.constant 5 : index
    %c2_154 = arith.constant 2 : index
    %306 = memref.load %arg3[%c5_153, %c2_154] : memref<8x4xf32, #tpu.memory_space<smem>>
    %307 = vector.broadcast %306 : f32 to vector<16x16xf32>
    %308 = arith.mulf %157, %307 : vector<16x16xf32>
    %309 = arith.addf %305, %308 : vector<16x16xf32>
    %c5_155 = arith.constant 5 : index
    %c3_156 = arith.constant 3 : index
    %310 = memref.load %arg3[%c5_155, %c3_156] : memref<8x4xf32, #tpu.memory_space<smem>>
    %311 = vector.broadcast %310 : f32 to vector<16x16xf32>
    %312 = arith.mulf %208, %311 : vector<16x16xf32>
    %313 = arith.addf %309, %312 : vector<16x16xf32>
    %c0_157 = arith.constant 0 : index
    %c5_158 = arith.constant 5 : index
    %c0_159 = arith.constant 0 : index
    %c0_160 = arith.constant 0 : index
    %314 = vector.load %arg4[%c0_157, %c5_158, %c0_159, %c0_160] : memref<1x8x16x16xf32, #tpu.memory_space<vmem>>, vector<1x1x16x16xf32>
    %315 = vector.shape_cast %314 : vector<1x1x16x16xf32> to vector<16x16xf32>
    %316 = vector.shape_cast %313 : vector<16x16xf32> to vector<1x1x16x16xf32>
    tpu.vector_store %arg4[%c0_157, %c5_158, %c0_159, %c0_160], %316 {strides = array<i32>} : memref<1x8x16x16xf32, #tpu.memory_space<vmem>>, vector<1x1x16x16xf32>,
    %c6_161 = arith.constant 6 : index
    %c0_162 = arith.constant 0 : index
    %317 = memref.load %arg3[%c6_161, %c0_162] : memref<8x4xf32, #tpu.memory_space<smem>>
    %318 = vector.broadcast %317 : f32 to vector<16x16xf32>
    %319 = arith.mulf %55, %318 : vector<16x16xf32>
    %c6_163 = arith.constant 6 : index
    %c1_164 = arith.constant 1 : index
    %320 = memref.load %arg3[%c6_163, %c1_164] : memref<8x4xf32, #tpu.memory_space<smem>>
    %321 = vector.broadcast %320 : f32 to vector<16x16xf32>
    %322 = arith.mulf %106, %321 : vector<16x16xf32>
    %323 = arith.addf %319, %322 : vector<16x16xf32>
    %c6_165 = arith.constant 6 : index
    %c2_166 = arith.constant 2 : index
    %324 = memref.load %arg3[%c6_165, %c2_166] : memref<8x4xf32, #tpu.memory_space<smem>>
    %325 = vector.broadcast %324 : f32 to vector<16x16xf32>
    %326 = arith.mulf %157, %325 : vector<16x16xf32>
    %327 = arith.addf %323, %326 : vector<16x16xf32>
    %c6_167 = arith.constant 6 : index
    %c3_168 = arith.constant 3 : index
    %328 = memref.load %arg3[%c6_167, %c3_168] : memref<8x4xf32, #tpu.memory_space<smem>>
    %329 = vector.broadcast %328 : f32 to vector<16x16xf32>
    %330 = arith.mulf %208, %329 : vector<16x16xf32>
    %331 = arith.addf %327, %330 : vector<16x16xf32>
    %c0_169 = arith.constant 0 : index
    %c6_170 = arith.constant 6 : index
    %c0_171 = arith.constant 0 : index
    %c0_172 = arith.constant 0 : index
    %332 = vector.load %arg4[%c0_169, %c6_170, %c0_171, %c0_172] : memref<1x8x16x16xf32, #tpu.memory_space<vmem>>, vector<1x1x16x16xf32>
    %333 = vector.shape_cast %332 : vector<1x1x16x16xf32> to vector<16x16xf32>
    %334 = vector.shape_cast %331 : vector<16x16xf32> to vector<1x1x16x16xf32>
    tpu.vector_store %arg4[%c0_169, %c6_170, %c0_171, %c0_172], %334 {strides = array<i32>} : memref<1x8x16x16xf32, #tpu.memory_space<vmem>>, vector<1x1x16x16xf32>,
    %c7_173 = arith.constant 7 : index
    %c0_174 = arith.constant 0 : index
    %335 = memref.load %arg3[%c7_173, %c0_174] : memref<8x4xf32, #tpu.memory_space<smem>>
    %336 = vector.broadcast %335 : f32 to vector<16x16xf32>
    %337 = arith.mulf %55, %336 : vector<16x16xf32>
    %c7_175 = arith.constant 7 : index
    %c1_176 = arith.constant 1 : index
    %338 = memref.load %arg3[%c7_175, %c1_176] : memref<8x4xf32, #tpu.memory_space<smem>>
    %339 = vector.broadcast %338 : f32 to vector<16x16xf32>
    %340 = arith.mulf %106, %339 : vector<16x16xf32>
    %341 = arith.addf %337, %340 : vector<16x16xf32>
    %c7_177 = arith.constant 7 : index
    %c2_178 = arith.constant 2 : index
    %342 = memref.load %arg3[%c7_177, %c2_178] : memref<8x4xf32, #tpu.memory_space<smem>>
    %343 = vector.broadcast %342 : f32 to vector<16x16xf32>
    %344 = arith.mulf %157, %343 : vector<16x16xf32>
    %345 = arith.addf %341, %344 : vector<16x16xf32>
    %c7_179 = arith.constant 7 : index
    %c3_180 = arith.constant 3 : index
    %346 = memref.load %arg3[%c7_179, %c3_180] : memref<8x4xf32, #tpu.memory_space<smem>>
    %347 = vector.broadcast %346 : f32 to vector<16x16xf32>
    %348 = arith.mulf %208, %347 : vector<16x16xf32>
    %349 = arith.addf %345, %348 : vector<16x16xf32>
    %c0_181 = arith.constant 0 : index
    %c7_182 = arith.constant 7 : index
    %c0_183 = arith.constant 0 : index
    %c0_184 = arith.constant 0 : index
    %350 = vector.load %arg4[%c0_181, %c7_182, %c0_183, %c0_184] : memref<1x8x16x16xf32, #tpu.memory_space<vmem>>, vector<1x1x16x16xf32>
    %351 = vector.shape_cast %350 : vector<1x1x16x16xf32> to vector<16x16xf32>
    %352 = vector.shape_cast %349 : vector<16x16xf32> to vector<1x1x16x16xf32>
    tpu.vector_store %arg4[%c0_181, %c7_182, %c0_183, %c0_184], %352 {strides = array<i32>} : memref<1x8x16x16xf32, #tpu.memory_space<vmem>>, vector<1x1x16x16xf32>,
    return
  }
  func.func @transform_0(%arg0: i32) -> (i32, i32, i32, i32) {
    %c0_i32 = arith.constant 0 : i32
    %c0_i32_0 = arith.constant 0 : i32
    %c0_i32_1 = arith.constant 0 : i32
    %c0_i32_2 = arith.constant 0 : i32
    return %arg0, %c0_i32, %c0_i32_0, %c0_i32_1 : i32, i32, i32, i32
  }
  func.func @transform_1(%arg0: i32) -> (i32, i32) {
    %c0_i32 = arith.constant 0 : i32
    %c0_i32_0 = arith.constant 0 : i32
    %c0_i32_1 = arith.constant 0 : i32
    return %c0_i32, %c0_i32_0 : i32, i32
  }
  func.func @transform_2(%arg0: i32) -> (i32, i32) {
    %c0_i32 = arith.constant 0 : i32
    %c0_i32_0 = arith.constant 0 : i32
    %c0_i32_1 = arith.constant 0 : i32
    return %c0_i32, %c0_i32_0 : i32, i32
  }
  func.func @transform_3(%arg0: i32) -> (i32, i32, i32, i32) {
    %c0_i32 = arith.constant 0 : i32
    %c0_i32_0 = arith.constant 0 : i32
    %c0_i32_1 = arith.constant 0 : i32
    %c0_i32_2 = arith.constant 0 : i32
    return %arg0, %c0_i32, %c0_i32_0, %c0_i32_1 : i32, i32, i32, i32
  }
}

</mosaic_0001>

<bundles_post_ra>
// kernel: dil_conv.1
= control target key start
LH: loop header
LB: loop body
LE: loop exit
PB: predicated region body
PF: predicated region fallthrough
CT: control target
= control target key end

     0   :  { %s2491_s0 = inlined_call_operand.hbm [shape: f32[2,4,16,16], index: 0, kind: input, shape index: {}]   ;;  %s2492_s1 = inlined_call_operand.vmem [shape: f32[4,9], index: 1, kind: input, shape index: {}]   ;;  %s2493_s2 = inlined_call_operand.vmem [shape: f32[8,4], index: 2, kind: input, shape index: {}]   ;;  %s2494_s3 = inlined_call_operand.hbm [shape: f32[2,8,16,16], index: 3, kind: output, shape index: {}]  }
   0x1   :  { %2508 = sst [smem:[#allocation21_spill]] %s2491_s0 }
   0x2   :  { %2509 = sst [smem:[#allocation22_spill]] %s2492_s1 }
   0x3   :  { %2510 = sst [smem:[#allocation23_spill]] %s2493_s2 }
   0x4   :  { %8 = vsyncpa [#allocation4], 0 }
   0x5   :  { %10 = vsyncpa [#allocation4 + $0x1], 0 }
   0x6   :  { %11 = vsyncpa [#allocation6], 0 }
   0x7   :  { %12 = vsyncpa [#allocation9], 0 }
   0x8   :  { %13 = vsyncpa [#allocation5], 0 }
   0x9   :  { %15 = vsyncpa [#allocation5 + $0x1], 0  ;;  %s1556_s12 = smov 0   ;;  %s1558_s13 = smov 0  }
   0xa   :  { %s1560_s14 = smov 0   ;;  %s1562_s15 = smov 0  }
   0xb LB: > { %2511 = sst [smem:[#allocation15_spill]] %s1514_s13  ;;  %s1577_s16 = sadd.s32 4294967295, %s1522_s15   ;;  %s1522_s15 = sphi %s1562_s15, %s2540_s15   ;;  %s1518_s14 = sphi %s1560_s14, %s2543_s14   ;;  %s1514_s13 = sphi %s1558_s13, %s2542_s13   ;;  %s1510_s12 = sphi %s1556_s12, %s2541_s12  }
   0xc   : > { %2512 = sst [smem:[#allocation16_spill]] %s1518_s14  ;;  %s1213_s17 = sadd.s32 4294967294, %s1522_s15  }
   0xd   : > { %2513 = sst [smem:[#allocation17_spill]] %s1522_s15  ;;  %s1581_s18 = sadd.s32 1, %s1522_s15  }
   0xe   : > { %2514 = sst [smem:[#allocation18_spill]] %s1581_s18  ;;  %s28_s19 = sadd.s32 1, %s1518_s14 }
   0xf   : > { %s25_s20 = ssub.s32 %s1522_s15, %s1581_s18  ;;  %p35_p0 = scmp.ne.s32.totalorder %s1518_s14, %s1514_s13 }
  0x10   : > { %p26_p1 = scmp.eq.s32.totalorder %s25_s20, 0  ;;  %p36_p2 = scmp.eq.s32.totalorder %s1522_s15, 0 }
  0x11   : > { %p41_p3 = scmp.ne.s32.totalorder %s1514_s13, %s1510_s12  ;;  %p2495_p4 = scmp.eq.s32.totalorder %s1577_s16, 0 }
  0x12   : > { %s1593_s21 = scalar_select %p26_p1, %s1518_s14, %s28_s19  }
  0x13   : > { %p1595_p5 = por %p36_p2, %p35_p0  ;;  %p1601_p6 = por %p2495_p4, %p41_p3 }
  0x14   : > { %2515 = sst [smem:[#allocation19_spill]] %s1593_s21  ;;  %p107_p7 = scmp.eq.s32.totalorder %s1577_s16, 1 }
  0x15   : > { %s2517_s23 = scalar_select %p1601_p6, 1, 0 }
  0x16   : > { %p113_p8 = scmp.eq.s32.totalorder %s1213_s17, 1  ;;  %p1214_p9 = scmp.ge.s32.totalorder %s1522_s15, 1 }
  0x17   : > { %p120_p10 = scmp.lt.s32.totalorder %s1522_s15, 3  ;;  %p1608_p11 = por %p107_p7, %p35_p0 }
  0x18   : > { %p1612_p12 = por %p113_p8, %p41_p3  ;;  %s2522_s1 = sld [smem:[#allocation22_spill]] }
  0x19   : > { %s2518_s24 = scalar_select %p1608_p11, 1, 0 }
  0x1a   : > { %s2519_s25 = scalar_select %p1612_p12, 1, 0 }
  0x1b   : > { %p1616_p13 = pnand %p1214_p9, %p120_p10  ;;  %p1342_p2 = scmp.lt.s32.totalorder %s1522_s15, 2 }
  0x1c   : > { %2520 = sst [smem:[#allocation20_spill]] %s2519_s25  ;;  %s2524_s2 = sld [smem:[#allocation23_spill]] }
  0x1d   : > { %s2521_s26 = scalar_select %p1616_p13, 1, 0 }
  0x1e   : > { %s133_s29 = sshll.u32 %s2522_s1, 4  ;;  %p1325_p1 = pneg %p1616_p13  ;;  %s134_s29 = int_to_ptr.vmem [resolvable:$true] %s133_s29 }
  0x1f   : > { %p1638_p3 = pnand %p1342_p2, %p1595_p5  ;;  %s1388_s8 = scalar_lea.vmem %s134_s29, 64 }
  0x20   : > { %p1629_p7 = pnand %p1325_p1, %p2495_p4  ;;  %p1389_p8 = scmp.ne.s32.totalorder %s134_s29, %s1388_s8 }
  0x21   : > { %s2525_s7 = scalar_select %p1638_p3, 1, 0 }
  0x22   : > { %s144_s6 = sshll.u32 %s2524_s2, 4  ;;  %p1390_p9 = pneg %p1629_p7  ;;  %s145_s6 = int_to_ptr.vmem [resolvable:$true] %s144_s6 }
  0x23   : > { %p1396_p0 = scmp.lt.s32.totalorder %s134_s29, %s134_s29  ;;  %p1397_p4 = scmp.lt.s32.totalorder %s1388_s8, %s1388_s8 }
  0x24   : > { %p1391_p10 = pnand %p1390_p9, %p1389_p8 }
  0x25   : > { %p1398_p12 = por %p1397_p4, %p1396_p0 }
  0x26   : > { %p1392_p1 = pneg %p1391_p10 }
  0x28   : > { %p1399_p11 = pnand %p1398_p12, %p1392_p1 }
  0x2a   : > { %1402 = shalt.err (!%p1399_p11)
}
  0x2b   : > { %s1524_s9 = smov [#allocation7]   ;;  %s155_s10 = sand.u32 1, %s1518_s14  }
  0x2c   : > { %1328 = dma.vmem_to_smem (!%p1629_p7), %s134_s29, 64, %s1524_s9, [#allocation6]  }
  0x2d   : > { %s1403_s11 = scalar_lea.vmem %s145_s6, 128  ;;  %p1411_p8 = scmp.lt.s32.totalorder %s145_s6, %s145_s6 }
  0x2e   : > { %p1404_p5 = scmp.ne.s32.totalorder %s145_s6, %s1403_s11  ;;  %p1412_p10 = scmp.lt.s32.totalorder %s1403_s11, %s1403_s11 }
  0x30   : > { %p1406_p2 = pnand %p1404_p5, %p1390_p9  ;;  %p1413_p13 = por %p1412_p10, %p1411_p8 }
  0x32   : > { %p1407_p6 = pneg %p1406_p2 }
  0x34   : > { %p1414_p3 = pnand %p1413_p13, %p1407_p6 }
  0x36   : > { %1417 = shalt.err (!%p1414_p3)
}
  0x37   : > { %s1525_s17 = smov [#allocation8]   ;;  %s1218_s19 = sshll.u32 %s155_s10, 6 }
  0x38   : > { %1331 = dma.vmem_to_smem (!%p1629_p7), %s145_s6, 128, %s1525_s17, [#allocation9]  }
  0x39   : > { %s1311_s20 = sshll.u32 %s1522_s15, 10  ;;  %s2526_s0 = sld [smem:[#allocation21_spill]] }
  0x3a   : > { %s159_s29 = scalar_lea.vmem [#allocation3], %s1218_s19  ;;  %s1663_s30 = scalar_lea.sflag [#allocation4], %s155_s10 }
  0x3b   : > { %s166_s4 = sshll.u32 %s159_s29, 4  ;;  %p2527_p6 = scmp.ne.s32.totalorder %s2525_s7, 0  ;;  %s1661_s4 = int_to_ptr.vmem [resolvable:$true] %s166_s4 }
  0x3d   : > { %p1420_p11 = pneg %p2527_p6 }
  0x3f   : > { %s1659_s28 = scalar_lea.hbm %s2526_s0, %s1311_s20  ;;  %s1423_s9 = scalar_lea.hbm %s2526_s0, 2048 }
  0x40   : > { %s1418_s5 = scalar_lea.hbm %s1659_s28, 1024  ;;  %p1424_p0 = scmp.lt.u32.totalorder %s1659_s28, %s2526_s0 }
  0x41   : > { %p1419_p4 = scmp.ne.s32.totalorder %s1659_s28, %s1418_s5  ;;  %p1425_p7 = scmp.lt.u32.totalorder %s1423_s9, %s1418_s5 }
  0x42   : > { %p1427_p9 = scmp.lt.u32.totalorder %s1418_s5, %s1659_s28 }
  0x43   : > { %p1421_p12 = pnand %p1420_p11, %p1419_p4  ;;  %p1426_p3 = por %p1425_p7, %p1424_p0 }
  0x45   : > { %p1422_p13 = pneg %p1421_p12  ;;  %p1428_p1 = por %p1427_p9, %p1426_p3 }
  0x47   : > { %p1429_p5 = pnand %p1428_p1, %p1422_p13 }
  0x49   : > { %1432 = shalt.err (!%p1429_p5)
}
  0x4a   : > { %s1433_s10 = scalar_lea.vmem %s1661_s4, 1024  ;;  %s1526_s19 = smov [#allocation3]  }
  0x4b   : > { %p1434_p2 = scmp.ne.s32.totalorder %s1661_s4, %s1433_s10  ;;  %s1438_s20 = sshll.u32 %s1526_s19, 4  ;;  %s1439_s20 = int_to_ptr.vmem [resolvable:$false] %s1438_s20 }
  0x4c   : > { %s1440_s22 = scalar_lea.vmem %s1439_s20, 2048  ;;  %p1441_p4 = scmp.lt.s32.totalorder %s1661_s4, %s1439_s20 }
  0x4d   : > { %p1436_p8 = pnand %p1434_p2, %p1420_p11  ;;  %p1442_p12 = scmp.lt.s32.totalorder %s1440_s22, %s1433_s10 }
  0x4f   : > { %p1437_p10 = pneg %p1436_p8  ;;  %p1443_p0 = por %p1442_p12, %p1441_p4 }
  0x51   : > { %p1444_p7 = pnand %p1443_p0, %p1437_p10 }
  0x53   : > { %1447 = shalt.err (!%p1444_p7)
}
  0x54   : > { %s1527_s27 = smov 128   ;;  %s1528_s29 = smov 8  }
  0x55   : > { %1335 = dma.hbm_to_vmem [thread:$0]  (!%p2527_p6), %s1659_s28, 1024, %s1661_s4, %s1663_s30, %s1527_s27, %s1527_s27, %s1528_s29  }
  0x56   : > { %p2528_p11 = scmp.ne.s32.totalorder %s2521_s26, 0 }
  0x57   : > { %s1694_s5 = sand.u32 (!%p2528_p11), 1, %s1514_s13   ;;  %p2529_p13 = scmp.ne.s32.totalorder (!%p2528_p11), %s2517_s23, 0 }
  0x58   : > { %178 = sbr.rel (%p2528_p11) target bundleno = 475 (0x1db), region = 32  ;;  %s1222_s6 = sshll.u32 (!%p2528_p11), %s1694_s5, 6 }
  0x59   : > { %s181_s8 = scalar_lea.sflag (!%p2528_p11), [#allocation4], %s1694_s5  ;;  %s1698_s9 = scalar_lea.vmem (!%p2528_p11), [#allocation3], %s1222_s6 }
  0x5f   : > { %1493 = dma.done.wait (%p2529_p13), %s181_s8, 1024  }
  0x60   : > { %1495 = vsyncadd (%p2529_p13), %s181_s8, 4294966272  ;;  %p2530_p6 = scmp.eq.s32.totalorder %s1577_s16, 0 }
  0x62   : > { %1497 = dma.done.wait (%p2530_p6), [#allocation6], 64   ;;  %p2531_p3 = pmov %p2530_p6 }
  0x64   : > { %1499 = vsyncadd (%p2531_p3), [#allocation6], 4294967232  ;;  %p2532_p9 = pmov %p2531_p3 }
  0x65   : > { %p2533_p1 = pmov %p2531_p3 }
  0x66   : > { %1501 = dma.done.wait (%p2532_p9), [#allocation9], 128  }
  0x67   : > { %1503 = vsyncadd (%p2533_p1), [#allocation9], 4294967168 }
  0x68   : > { %197 = sfence }
  0x69   : > { %v230_v0 = vld [vmem:[%s1698_s9] sm:$0xff]  ;;  %v232_v1 = vld [vmem:[%s1698_s9 + $0x10] sm:$0xff]  ;;  %vm216_vm0 = vcmask 162816   ;;  %s1529_s23 = smov 2   ;;  %vm219_vm1 = vcmask 158720   ;;  %v231_v2 = vld [vmem:[%s1698_s9 + $0x8] sm:$0xff] }
  0x6a   : > { %246 = vrot.lane.b32.xlu0 %v230_v0, %s1529_s23  ;;  %250 = vrot.lane.b32.xlu1 %v232_v1, %s1529_s23  ;;  %v233_v3 = vld [vmem:[%s1698_s9 + $0x18] sm:$0xff]  ;;  %v1530_v4 = vmov 0.0   ;;  %v235_v5 = vld [vmem:[%s1698_s9 + $0x28] sm:$0xff]  ;;  %vm270_vm2 = vcmask 146448   ;;  %s1226_s26 = sld [smem:[#allocation7 + $0x1]]  ;;  %s1722_s7 = sld [smem:[#allocation7 + $0x2]] }
  0x6b   : > { %217 = vst.msk [vmem:[#allocation2] sm:$0xff] %vm216_vm0, %v1530_v4  ;;  %218 = vst.msk [vmem:[#allocation2 + $0x8] sm:$0xff] %vm216_vm0, %v1530_v4  ;;  %v234_v6 = vld [vmem:[%s1698_s9 + $0x20] sm:$0xff]  ;;  %v237_v7 = vld [vmem:[%s1698_s9 + $0x38] sm:$0xff]  ;;  %s1724_s28 = sld [smem:[#allocation7 + $0x81]]  ;;  %s1734_s4 = sld [smem:[#allocation7 + $0x82]] }
  0x6c   : > { %221 = vst.msk [vmem:[#allocation2 + $0x18] sm:$0xff] %vm216_vm0, %v1530_v4  ;;  %222 = vst.msk [vmem:[#allocation2 + $0x20] sm:$0xff] %vm216_vm0, %v1530_v4  ;;  %v236_v8 = vld [vmem:[%s1698_s9 + $0x30] sm:$0xff]  ;;  %s1531_s30 = smov 126   ;;  %s1742_s11 = sld [smem:[#allocation7 + $0x101]]  ;;  %vm384_vm3 = vcmask 1043456  }
  0x6d   : > { %224 = vst.msk [vmem:[#allocation2 + $0x30] sm:$0xff] %vm216_vm0, %v1530_v4  ;;  %225 = vst.msk [vmem:[#allocation2 + $0x38] sm:$0xff] %vm216_vm0, %v1530_v4  ;;  %s2500_s17 = smov 124   ;;  %s1751_s10 = sld [smem:[#allocation7 + $0x4]]  ;;  %vm324_vm4 = vcmask 1045504   ;;  %vm926_vm5 = vcmask 130048  }
  0x6e   : > { %227 = vst.msk [vmem:[#allocation2 + $0x48] sm:$0xff] %vm216_vm0, %v1530_v4  ;;  %228 = vst.msk [vmem:[#allocation2 + $0x50] sm:$0xff] %vm216_vm0, %v1530_v4  ;;  %248 = vrot.lane.b32.xlu0 %v231_v2, %s1529_s23  ;;  %252 = vrot.lane.b32.xlu1 %v233_v3, %s1529_s23  ;;  %s1753_s19 = sld [smem:[#allocation7 + $0x102]]  ;;  %s1755_s20 = sld [smem:[#allocation7 + $0x5]] }
  0x6f   : > { %220 = vst.msk [vmem:[#allocation2 + $0x10] sm:$0xf] %vm219_vm1, %v1530_v4  ;;  %223 = vst.msk [vmem:[#allocation2 + $0x28] sm:$0xf] %vm219_vm1, %v1530_v4  ;;  %s1758_s22 = sld [smem:[#allocation7 + $0x84]]  ;;  %s1760_s27 = sld [smem:[#allocation7 + $0x85]] }
  0x70   : > { %226 = vst.msk [vmem:[#allocation2 + $0x40] sm:$0xf] %vm219_vm1, %v1530_v4  ;;  %229 = vst.msk [vmem:[#allocation2 + $0x58] sm:$0xf] %vm219_vm1, %v1530_v4  ;;  %v289_v13 = vstv %s1226_s26  ;;  %v303_v18 = vstv %s1722_s7  ;;  %s1765_s29 = sld [smem:[#allocation7 + $0x7]]  ;;  %s1767_s6 = sld [smem:[#allocation7 + $0x8]] }
  0x71   : > { %v447_v21 = vstv %s1724_s28  ;;  %v461_v29 = vstv %s1734_s4  ;;  %s1771_s8 = sld [smem:[#allocation7 + $0x181]]  ;;  %s1773_s9 = sld [smem:[#allocation7 + $0x87]] }
  0x72   : > { %256 = vrot.lane.b32.xlu1 %v235_v5, %s1529_s23  ;;  %254 = vrot.lane.b32.xlu0 %v234_v6, %s1529_s23  ;;  %v603_v31 = vstv %s1742_s11  ;;  %s1780_s26 = sld [smem:[#allocation7 + $0x105]]  ;;  %s1784_s7 = sld [smem:[#allocation7 + $0x182]] }
  0x73   : > { %s1786_s28 = sld [smem:[#allocation7 + $0x3]]  ;;  %s1788_s4 = sld [smem:[#allocation7 + $0x184]]  ;;  %v335_v38 = vstv %s1751_s10 }
  0x74   : > { %s2534_s11 = smov 124   ;;  %s1795_s0 = sld [smem:[#allocation7 + $0x83]]  ;;  %v617_v36 = vstv %s1753_s19  ;;  %v356_v41 = vstv %s1755_s20 }
  0x75   : > { %s1797_s1 = sld [smem:[#allocation7 + $0x86]]  ;;  %s1802_s2 = sld [smem:[#allocation7 + $0x103]]  ;;  %v492_v42 = vstv %s1758_s22  ;;  %v513_v45 = vstv %s1760_s27 }
  0x76   : > { %260 = vrot.lane.b32.xlu1 %v237_v7, %s1529_s23  ;;  %258 = vrot.lane.b32.xlu0 %v236_v8, %s1529_s23  ;;  %s1778_s23 = sld [smem:[#allocation7 + $0x104]]  ;;  %v1817_v46 = vstv %s1765_s29  ;;  %v1820_v47 = vstv %s1767_s6  ;;  %s1844_s10 = sld [smem:[#allocation7 + $0x106]] }
  0x77   : > { %v759_v44 = vstv %s1771_s8  ;;  %v1828_v51 = vstv %s1773_s9  ;;  %s1250_s19 = sld [smem:[#allocation7 + $0x107]]  ;;  %s1251_s20 = sld [smem:[#allocation7 + $0x108]] }
  0x78   : > { %v773_v48 = vstv %s1784_s7  ;;  %v1825_v50 = vstv %s1780_s26  ;;  %s1259_s22 = sld [smem:[#allocation7 + $0x187]]  ;;  %s1260_s27 = sld [smem:[#allocation7 + $0x188]] }
  0x79   : > { %v1836_v54 = vstv %s1788_s4  ;;  %v1839_v55 = vstv %s1786_s28  ;;  %s282_s29 = sld [smem:[#allocation7]]  ;;  %s2230_s21 = sld [smem:[#allocation8 + $0x202]] }
  0x7a   : > { %v1854_v60 = vstv %s1795_s0  ;;  %s1885_s0 = sld [smem:[#allocation7 + $0x183]]  ;;  %s1234_s6 = sld [smem:[#allocation7 + $0x80]] }
  0x7b   : > { %v1857_v61 = vstv %s1797_s1  ;;  %v1865_v2 = vstv %s1802_s2  ;;  %s1887_s1 = sld [smem:[#allocation7 + $0x186]]  ;;  %s2028_s2 = sld [smem:[#allocation7 + $0x185]] }
  0x7c   : > { %v648_v49 = vstv %s1778_s23  ;;  %s1243_s8 = sld [smem:[#allocation7 + $0x100]]  ;;  %s2232_s14 = sld [smem:[#allocation8 + $0x282]] }
  0x7d   : > { %s2187_s9 = sld [smem:[#allocation8]]  ;;  %s2234_s13 = sld [smem:[#allocation8 + $0x302]] }
  0x7e   : > { %s2189_s23 = sld [smem:[#allocation8 + $0x80]]  ;;  %s2238_s18 = sld [smem:[#allocation8 + $0x382]] }
  0x7f   : > { %s2191_s26 = sld [smem:[#allocation8 + $0x100]]  ;;  %s2305_s15 = sld [smem:[#allocation8 + $0x183]] }
  0x80   : > { %s2193_s7 = sld [smem:[#allocation8 + $0x180]]  ;;  %s2307_s25 = sld [smem:[#allocation8 + $0x203]] }
  0x81   : > { %s2195_s28 = sld [smem:[#allocation8 + $0x200]]  ;;  %p2535_p2 = scmp.ne.s32.totalorder %s2518_s24, 0 }
  0x82   : > { %s2200_s4 = sld [smem:[#allocation8 + $0x280]] }
  0xdc   : > { %v247_v9 = vpop.permute.xlu0 %246  ;;  %v251_v10 = vpop.permute.xlu1 %250 }
  0xdd   : > { %271 = vst.msk [vmem:[#allocation2 + $0x2] sm:$0xff] %vm270_vm2, %v247_v9  ;;  %273 = vst.msk [vmem:[#allocation2 + $0x1a] sm:$0xff] %vm270_vm2, %v251_v10 }
  0xe0   : > { %v249_v11 = vpop.permute.xlu0 %248  ;;  %v253_v12 = vpop.permute.xlu1 %252 }
  0xe1   : > { %272 = vst.msk [vmem:[#allocation2 + $0xa] sm:$0xff] %vm270_vm2, %v249_v11  ;;  %274 = vst.msk [vmem:[#allocation2 + $0x22] sm:$0xff] %vm270_vm2, %v253_v12 }
  0xe4   : > { %v1728_v14 = vld [vmem:[#allocation2] sm:$0xff]  ;;  %v257_v15 = vpop.permute.xlu1 %256  ;;  %v255_v16 = vpop.permute.xlu0 %254  ;;  %v1762_v28 = vld [vmem:[#allocation2 + $0x18] sm:$0xff] }
  0xe5   : > { %v290_v17 = vmul.f32 %v289_v13, %v1728_v14  ;;  %276 = vst.msk [vmem:[#allocation2 + $0x3a] sm:$0xff] %vm270_vm2, %v257_v15  ;;  %275 = vst.msk [vmem:[#allocation2 + $0x32] sm:$0xff] %vm270_vm2, %v255_v16  ;;  %v304_v25 = vmul.f32 %v303_v18, %v1728_v14  ;;  %v448_v32 = vmul.f32 %v447_v21, %v1762_v28 }
  0xe6   : > { %v462_v37 = vmul.f32 %v461_v29, %v1762_v28  ;;  %v417_v59 = vmul.f32 %v1820_v47, %v1728_v14  ;;  %v336_v63 = vmul.f32 %v335_v38, %v1728_v14  ;;  %v357_v0 = vmul.f32 %v356_v41, %v1728_v14 }
  0xe7   : > { %294 = vrot.lane.b32.xlu0 %v290_v17, %s1531_s30  ;;  %v493_v1 = vmul.f32 %v492_v42, %v1762_v28  ;;  %v514_v5 = vmul.f32 %v513_v45, %v1762_v28 }
  0xe8   : > { %v1737_v19 = vld [vmem:[#allocation2 + $0x8] sm:$0xff]  ;;  %v1739_v20 = vld [vmem:[#allocation2 + $0x20] sm:$0xff]  ;;  %v261_v22 = vpop.permute.xlu1 %260  ;;  %v259_v23 = vpop.permute.xlu0 %258  ;;  %v1833_v53 = vld [vmem:[#allocation2 + $0x10] sm:$0xf]  ;;  %v423_v15 = vrot.slane %v417_v59, 4  ;;  %v342_v17 = vrot.slane %v336_v63, 2 }
  0xe9   : > { %v291_v24 = vmul.f32 %v289_v13, %v1737_v19  ;;  %278 = vst.msk [vmem:[#allocation2 + $0x52] sm:$0xff] %vm270_vm2, %v261_v22  ;;  %277 = vst.msk [vmem:[#allocation2 + $0x4a] sm:$0xff] %vm270_vm2, %v259_v23  ;;  %v449_v26 = vmul.f32 %v447_v21, %v1739_v20  ;;  %v305_v27 = vmul.f32 %v303_v18, %v1737_v19  ;;  %v1849_v58 = vld [vmem:[#allocation2 + $0x28] sm:$0xf] }
  0xea   : > { %v463_v33 = vmul.f32 %v461_v29, %v1739_v20  ;;  %v1831_v52 = vmul.f32 %v335_v38, %v1737_v19  ;;  %v338_v4 = vmul.f32 %v335_v38, %v1833_v53  ;;  %v1872_v6 = vmul.f32 %v1820_v47, %v1737_v19 }
  0xeb   : > { %296 = vrot.lane.b32.xlu1 %v291_v24, %s1531_s30  ;;  %308 = vrot.lane.b32.xlu0 %v304_v25, %s2500_s17  ;;  %v358_v8 = vmul.f32 %v356_v41, %v1737_v19  ;;  %v494_v9 = vmul.f32 %v492_v42, %v1739_v20  ;;  %v495_v10 = vmul.f32 %v492_v42, %v1849_v58  ;;  %v363_v29 = vrot.slane %v357_v0, 2 }
  0xec   : > { %v1775_v30 = vld [vmem:[#allocation2 + $0x38] sm:$0xff]  ;;  %v1799_v35 = vld [vmem:[#allocation2 + $0x30] sm:$0xff]  ;;  %v343_v7 = vrot.slane %v1831_v52, 2  ;;  %v1878_v11 = vld [vmem:[#allocation2 + $0x40] sm:$0xf]  ;;  %v424_v16 = vrot.slane %v1872_v6, 4  ;;  %v359_v18 = vmul.f32 %v356_v41, %v1833_v53  ;;  %v515_v21 = vmul.f32 %v513_v45, %v1739_v20 }
  0xed   : > { %v605_v34 = vmul.f32 %v603_v31, %v1775_v30  ;;  %v604_v39 = vmul.f32 %v603_v31, %v1799_v35  ;;  %v619_v40 = vmul.f32 %v617_v36, %v1775_v30  ;;  %v618_v3 = vmul.f32 %v617_v36, %v1799_v35 }
  0xee   : > { %v516_v22 = vmul.f32 %v513_v45, %v1849_v58  ;;  %v649_v23 = vmul.f32 %v648_v49, %v1799_v35  ;;  %v650_v24 = vmul.f32 %v648_v49, %v1775_v30  ;;  %v651_v25 = vmul.f32 %v648_v49, %v1878_v11 }
  0xef   : > { %310 = vrot.lane.b32.xlu1 %v305_v27, %s2500_s17  ;;  %454 = vrot.lane.b32.xlu0 %v449_v26, %s1531_s30  ;;  %s1790_s17 = sld [smem:[#allocation7 + $0x6]]  ;;  %v1898_v26 = vsel %vm384_vm3, %v423_v15, %v424_v16  ;;  %v345_v27 = vrot.slane %v338_v4, 2  ;;  %v499_v31 = vrot.slane %v493_v1, 2  ;;  %v500_v36 = vrot.slane %v494_v9, 2 }
  0xf0   : > { %v1812_v43 = vld [vmem:[#allocation2 + $0x50] sm:$0xff]  ;;  %v1859_v62 = vld [vmem:[#allocation2 + $0x48] sm:$0xff]  ;;  %v521_v41 = vrot.slane %v515_v21, 2  ;;  %v523_v42 = vrot.slane %v516_v22, 2  ;;  %v656_v45 = vrot.slane %v650_v24, 2  ;;  %v658_v49 = vrot.slane %v651_v25, 2 }
  0xf1   : > { %v761_v57 = vmul.f32 %v759_v44, %v1812_v43  ;;  %v760_v12 = vmul.f32 %v759_v44, %v1859_v62  ;;  %v775_v13 = vmul.f32 %v773_v48, %v1812_v43  ;;  %v774_v38 = vmul.f32 %v773_v48, %v1859_v62  ;;  %v1938_v9 = vld [vmem:[#allocation2 + $0x58] sm:$0xf] }
  0xf2   : > { %v655_v44 = vrot.slane %v649_v23, 2  ;;  %v1909_v52 = vmul.f32 %v1825_v50, %v1799_v35  ;;  %v1917_v48 = vmul.f32 %v1825_v50, %v1878_v11  ;;  %v1921_v59 = vmul.f32 %v1836_v54, %v1859_v62 }
  0xf3   : > { %452 = vrot.lane.b32.xlu1 %v448_v32, %s1531_s30  ;;  %468 = vrot.lane.b32.xlu0 %v463_v33, %s2534_s11  ;;  %v1901_v32 = vstv %s1844_s10  ;;  %v344_v33 = vsel %vm324_vm4, %v342_v17, %v343_v7  ;;  %v346_v63 = vsel %vm324_vm4, %v343_v7, %v345_v27  ;;  %v1928_v0 = vmul.f32 %v1836_v54, %v1812_v43  ;;  %s2204_s10 = sld [smem:[#allocation8 + $0x380]] }
  0xf4   : > { %v787_v1 = vstv %s1885_s0  ;;  %v501_v4 = vsel %vm324_vm4, %v499_v31, %v500_v36  ;;  %v524_v7 = vsel %vm324_vm4, %v521_v41, %v523_v42  ;;  %v676_v15 = vrot.slane %v1909_v52, 2  ;;  %s2206_s0 = sld [smem:[#allocation8 + $0x1]] }
  0xf5   : > { %v1842_v56 = vstv %s1790_s17  ;;  %v811_v21 = vrot.slane %v1921_v59, 2  ;;  %v812_v22 = vrot.slane %v1928_v0, 2  ;;  %v1955_v23 = vmul.f32 %v1836_v54, %v1938_v9  ;;  %s1242_s17 = sld [smem:[#allocation7 + $0x88]] }
  0xf6   : > { %v318_v24 = vmul.f32 %v1839_v55, %v1728_v14  ;;  %v319_v25 = vmul.f32 %v1839_v55, %v1737_v19  ;;  %v320_v27 = vmul.f32 %v1839_v55, %v1833_v53  ;;  %v477_v31 = vmul.f32 %v1854_v60, %v1739_v20 }
  0xf7   : > { %466 = vrot.lane.b32.xlu1 %v462_v37, %s2534_s11  ;;  %610 = vrot.lane.b32.xlu0 %v605_v34, %s1531_s30  ;;  %v364_v34 = vrot.slane %v358_v8, 2  ;;  %v502_v37 = vrot.slane %v495_v10, 2  ;;  %v396_v52 = vmul.f32 %v1817_v46, %v1728_v14  ;;  %v554_v59 = vmul.f32 %v1828_v51, %v1849_v58 }
  0xf8   : > { %v325_v54 = vrot.slane %v318_v24, 2  ;;  %v483_v55 = vrot.slane %v477_v31, 2  ;;  %v789_v24 = vmul.f32 %v787_v1, %v1812_v43  ;;  %v380_v31 = vmul.f32 %v1842_v56, %v1833_v53 }
  0xfb   : > { %608 = vrot.lane.b32.xlu1 %v604_v39, %s1531_s30  ;;  %624 = vrot.lane.b32.xlu0 %v619_v40, %s2534_s11  ;;  %v366_v39 = vrot.slane %v359_v18, 2  ;;  %v520_v40 = vrot.slane %v514_v5, 2  ;;  %v503_v5 = vsel %vm324_vm4, %v500_v36, %v502_v37  ;;  %v679_v18 = vrot.slane %v1917_v48, 2 }
  0xfc   : > { %v632_v36 = vmul.f32 %v1865_v2, %v1799_v35  ;;  %v633_v37 = vmul.f32 %v1865_v2, %v1775_v30 }
  0xfd   : > { %v367_v8 = vsel %vm324_vm4, %v364_v34, %v366_v39  ;;  %v522_v10 = vsel %vm324_vm4, %v520_v40, %v521_v41 }
  0xfe   : > { %v639_v42 = vrot.slane %v633_v37, 2 }
  0xff   : > { %622 = vrot.lane.b32.xlu1 %v618_v3, %s2534_s11  ;;  %766 = vrot.lane.b32.xlu0 %v761_v57, %s1531_s30  ;;  %v1913_v57 = vmul.f32 %v1825_v50, %v1775_v30  ;;  %v1932_v3 = vstv %s1887_s1  ;;  %v365_v50 = vsel %vm324_vm4, %v363_v29, %v364_v34  ;;  %v476_v29 = vmul.f32 %v1854_v60, %v1762_v28  ;;  %s2208_s1 = sld [smem:[#allocation8 + $0x81]] }
 0x100   : > { %v326_v34 = vrot.slane %v319_v25, 2  ;;  %v790_v25 = vmul.f32 %v787_v1, %v1938_v9 }
 0x101   : > { %v677_v17 = vrot.slane %v1913_v57, 2  ;;  %v482_v39 = vrot.slane %v476_v29, 2  ;;  %v379_v29 = vmul.f32 %v1842_v56, %v1737_v19 }
 0x102   : > { %v1976_v41 = vsel %vm324_vm4, %v325_v54, %v326_v34  ;;  %v795_v54 = vrot.slane %v789_v24, 2  ;;  %v847_v24 = vmul.f32 %v1932_v3, %v1859_v62 }
 0x103   : > { %764 = vrot.lane.b32.xlu1 %v760_v12, %s1531_s30  ;;  %780 = vrot.lane.b32.xlu0 %v775_v13, %s2534_s11  ;;  %v657_v12 = vsel %vm324_vm4, %v655_v44, %v656_v45  ;;  %v1944_v13 = vsel %vm324_vm4, %v656_v45, %v658_v49  ;;  %v634_v44 = vmul.f32 %v1865_v2, %v1878_v11  ;;  %v386_v37 = vrot.slane %v379_v29, 4 }
 0x104   : > { %v1984_v49 = vsel %vm324_vm4, %v482_v39, %v483_v55  ;;  %v536_v39 = vmul.f32 %v1857_v61, %v1739_v20 }
 0x107   : > { %778 = vrot.lane.b32.xlu1 %v774_v38, %s2534_s11  ;;  %347 = vrot.lane.b32.xlu0 %v344_v33, %s1531_s30  ;;  %v478_v33 = vmul.f32 %v1854_v60, %v1849_v58  ;;  %v328_v38 = vrot.slane %v320_v27, 2  ;;  %v638_v60 = vrot.slane %v632_v36, 2  ;;  %v378_v27 = vmul.f32 %v1842_v56, %v1728_v14 }
 0x109   : > { %v485_v40 = vrot.slane %v478_v33, 2  ;;  %v1981_v45 = vsel %vm324_vm4, %v326_v34, %v328_v38  ;;  %v797_v34 = vrot.slane %v790_v25, 2  ;;  %v385_v36 = vrot.slane %v378_v27, 4 }
 0x10a   : > { %v388_v38 = vrot.slane %v380_v31, 4 }
 0x10b   : > { %349 = vrot.lane.b32.xlu1 %v346_v63, %s1531_s30  ;;  %368 = vrot.lane.b32.xlu0 %v365_v50, %s2534_s11  ;;  %v1987_v63 = vsel %vm324_vm4, %v483_v55, %v485_v40  ;;  %v788_v50 = vmul.f32 %v787_v1, %v1859_v62  ;;  %v535_v1 = vmul.f32 %v1857_v61, %v1762_v28 }
 0x10c   : > { %v537_v55 = vmul.f32 %v1857_v61, %v1849_v58  ;;  %v2019_v40 = vsel %vm384_vm3, %v385_v36, %v386_v37  ;;  %v692_v61 = vmul.f32 %v1901_v32, %v1775_v30 }
 0x10d   : > { %v794_v2 = vrot.slane %v788_v50, 2 }
 0x10e   : > { %v544_v50 = vrot.slane %v537_v55, 4  ;;  %v698_v29 = vrot.slane %v692_v61, 4  ;;  %v553_v55 = vmul.f32 %v1828_v51, %v1739_v20 }
 0x10f   : > { %504 = vrot.lane.b32.xlu1 %v501_v4, %s1531_s30  ;;  %506 = vrot.lane.b32.xlu0 %v503_v5, %s1531_s30  ;;  %v1991_v4 = vsel %vm324_vm4, %v638_v60, %v639_v42  ;;  %v641_v5 = vrot.slane %v634_v44, 2  ;;  %v2011_v56 = vsel %vm324_vm4, %v794_v2, %v795_v54  ;;  %v2022_v60 = vsel %vm384_vm3, %v386_v37, %v388_v38 }
 0x110   : > { %v691_v44 = vmul.f32 %v1901_v32, %v1799_v35 }
 0x111   : > { %v2004_v33 = vsel %vm324_vm4, %v639_v42, %v641_v5  ;;  %v542_v42 = vrot.slane %v536_v39, 4  ;;  %v693_v5 = vmul.f32 %v1901_v32, %v1878_v11  ;;  %v678_v32 = vsel %vm324_vm4, %v676_v15, %v677_v17 }
 0x112   : > { %v697_v2 = vrot.slane %v691_v44, 4  ;;  %v398_v39 = vmul.f32 %v1817_v46, %v1833_v53  ;;  %v825_v44 = vstv %s2028_s2  ;;  %s2210_s2 = sld [smem:[#allocation8 + $0x101]] }
 0x113   : > { %370 = vrot.lane.b32.xlu1 %v367_v8, %s2534_s11  ;;  %525 = vrot.lane.b32.xlu0 %v522_v10, %s2534_s11  ;;  %v2014_v8 = vsel %vm324_vm4, %v795_v54, %v797_v34  ;;  %v541_v10 = vrot.slane %v535_v1, 4  ;;  %v2044_v27 = vsel %vm384_vm3, %v542_v42, %v544_v50  ;;  %v700_v31 = vrot.slane %v693_v5, 4 }
 0x114   : > { %v853_v54 = vrot.slane %v847_v24, 4  ;;  %v397_v34 = vmul.f32 %v1817_v46, %v1737_v19  ;;  %v402_v50 = vrot.slane %v396_v52, 4  ;;  %v405_v57 = vrot.slane %v398_v39, 4 }
 0x115   : > { %v2037_v25 = vsel %vm384_vm3, %v541_v10, %v542_v42  ;;  %v2060_v37 = vsel %vm384_vm3, %v698_v29, %v700_v31  ;;  %v552_v10 = vmul.f32 %v1828_v51, %v1762_v28  ;;  %v680_v42 = vsel %vm324_vm4, %v677_v17, %v679_v18 }
 0x116   : > { %v403_v46 = vrot.slane %v397_v34, 4  ;;  %v559_v17 = vrot.slane %v553_v55, 4  ;;  %v827_v5 = vmul.f32 %v825_v44, %v1812_v43  ;;  %v572_v24 = vstv %s1242_s17  ;;  %s2212_s17 = sld [smem:[#allocation8 + $0x181]] }
 0x117   : > { %527 = vrot.lane.b32.xlu1 %v524_v7, %s2534_s11  ;;  %660 = vrot.lane.b32.xlu0 %v657_v12, %s1531_s30  ;;  %v848_v7 = vmul.f32 %v1932_v3, %v1812_v43  ;;  %v849_v12 = vmul.f32 %v1932_v3, %v1938_v9  ;;  %v2057_v3 = vsel %vm384_vm3, %v697_v2, %v698_v29  ;;  %v558_v61 = vrot.slane %v552_v10, 4 }
 0x118   : > { %v404_v18 = vsel %vm384_vm3, %v402_v50, %v403_v46  ;;  %v406_v0 = vsel %vm384_vm3, %v403_v46, %v405_v57  ;;  %v561_v2 = vrot.slane %v554_v59, 4  ;;  %v828_v29 = vmul.f32 %v825_v44, %v1938_v9 }
 0x119   : > { %v854_v1 = vrot.slane %v848_v7, 4  ;;  %v856_v36 = vrot.slane %v849_v12, 4  ;;  %v833_v12 = vrot.slane %v827_v5, 2  ;;  %v419_v51 = vmul.f32 %v1820_v47, %v1833_v53 }
 0x11a   : > { %v573_v31 = vmul.f32 %v572_v24, %v1762_v28  ;;  %v575_v10 = vmul.f32 %v572_v24, %v1849_v58 }
 0x11b   : > { %662 = vrot.lane.b32.xlu1 %v1944_v13, %s1531_s30  ;;  %681 = vrot.lane.b32.xlu0 %v678_v32, %s2534_s11  ;;  %v2065_v15 = vsel %vm384_vm3, %v853_v54, %v854_v1  ;;  %v2068_v38 = vsel %vm384_vm3, %v854_v1, %v856_v36  ;;  %v814_v13 = vrot.slane %v1955_v23, 2  ;;  %v813_v23 = vsel %vm324_vm4, %v811_v21, %v812_v22 }
 0x11c   : > { %v826_v21 = vmul.f32 %v825_v44, %v1859_v62  ;;  %v574_v54 = vmul.f32 %v572_v24, %v1739_v20  ;;  %v562_v32 = vsel %vm384_vm3, %v559_v17, %v561_v2  ;;  %v835_v1 = vrot.slane %v828_v29, 2 }
 0x11d   : > { %v815_v48 = vsel %vm324_vm4, %v812_v22, %v814_v13  ;;  %v560_v22 = vsel %vm384_vm3, %v558_v61, %v559_v17  ;;  %v707_v36 = vstv %s1250_s19  ;;  %v426_v52 = vrot.slane %v419_v51, 4  ;;  %s2214_s19 = sld [smem:[#allocation8 + $0x201]] }
 0x11e   : > { %v832_v7 = vrot.slane %v826_v21, 2  ;;  %v579_v13 = vrot.slane %v573_v31, 4  ;;  %v580_v39 = vrot.slane %v574_v54, 4  ;;  %v836_v47 = vsel %vm324_vm4, %v833_v12, %v835_v1 }
 0x11f   : > { %683 = vrot.lane.b32.xlu1 %v680_v42, %s2534_s11  ;;  %816 = vrot.lane.b32.xlu0 %v813_v23, %s1531_s30  ;;  %v708_v53 = vmul.f32 %v707_v36, %v1799_v35  ;;  %v709_v55 = vmul.f32 %v707_v36, %v1775_v30  ;;  %v728_v42 = vstv %s1251_s20  ;;  %v863_v23 = vstv %s1259_s22  ;;  %s2216_s20 = sld [smem:[#allocation8 + $0x281]] }
 0x120   : > { %v834_v34 = vsel %vm324_vm4, %v832_v7, %v833_v12  ;;  %v427_v46 = vsel %vm384_vm3, %v424_v16, %v426_v52  ;;  %v581_v58 = vsel %vm384_vm3, %v579_v13, %v580_v39  ;;  %v582_v44 = vrot.slane %v575_v10, 4  ;;  %s2218_s22 = sld [smem:[#allocation8 + $0x301]] }
 0x121   : > { %v710_v50 = vmul.f32 %v707_v36, %v1878_v11  ;;  %v715_v57 = vrot.slane %v709_v55, 4  ;;  %v729_v61 = vmul.f32 %v728_v42, %v1799_v35  ;;  %v730_v17 = vmul.f32 %v728_v42, %v1775_v30 }
 0x122   : > { %v731_v16 = vmul.f32 %v728_v42, %v1878_v11  ;;  %v866_v12 = vmul.f32 %v863_v23, %v1938_v9 }
 0x123   : > { %818 = vrot.lane.b32.xlu1 %v815_v48, %s1531_s30  ;;  %407 = vrot.lane.b32.xlu0 %v404_v18, %s1531_s30  ;;  %v714_v48 = vrot.slane %v708_v53, 4  ;;  %v717_v6 = vrot.slane %v710_v50, 4  ;;  %v864_v18 = vmul.f32 %v863_v23, %v1859_v62  ;;  %v735_v21 = vrot.slane %v729_v61, 4 }
 0x124   : > { %v736_v5 = vrot.slane %v730_v17, 4  ;;  %v738_v2 = vrot.slane %v731_v16, 4  ;;  %v283_v53 = vstv %s282_s29  ;;  %s2222_s29 = sld [smem:[#allocation8 + $0x2]] }
 0x125   : > { %v716_v59 = vsel %vm384_vm3, %v714_v48, %v715_v57  ;;  %v718_v24 = vsel %vm384_vm3, %v715_v57, %v717_v6  ;;  %v870_v7 = vrot.slane %v864_v18, 4 }
 0x126   : > { %v737_v11 = vsel %vm384_vm3, %v735_v21, %v736_v5  ;;  %v739_v54 = vsel %vm384_vm3, %v736_v5, %v738_v2  ;;  %v597_v21 = vstv %s1243_s8  ;;  %s2226_s8 = sld [smem:[#allocation8 + $0x102]] }
 0x127   : > { %409 = vrot.lane.b32.xlu1 %v406_v0, %s1531_s30  ;;  %563 = vrot.lane.b32.xlu0 %v560_v22, %s1531_s30  ;;  %v865_v0 = vmul.f32 %v863_v23, %v1812_v43  ;;  %v884_v22 = vstv %s1260_s27  ;;  %v285_v23 = vmul.f32 %v283_v53, %v1737_v19  ;;  %s2220_s27 = sld [smem:[#allocation8 + $0x381]] }
 0x128   : > { %v885_v51 = vmul.f32 %v884_v22, %v1859_v62  ;;  %v886_v31 = vmul.f32 %v884_v22, %v1812_v43  ;;  %v887_v52 = vmul.f32 %v884_v22, %v1938_v9  ;;  %v284_v9 = vmul.f32 %v283_v53, %v1728_v14 }
 0x129   : > { %v871_v29 = vrot.slane %v865_v0, 4  ;;  %v599_v22 = vmul.f32 %v597_v21, %v1775_v30 }
 0x12a   : > { %v891_v1 = vrot.slane %v885_v51, 4  ;;  %v892_v36 = vrot.slane %v886_v31, 4  ;;  %v894_v10 = vrot.slane %v887_v52, 4 }
 0x12b   : > { %565 = vrot.lane.b32.xlu1 %v562_v32, %s1531_s30  ;;  %837 = vrot.lane.b32.xlu0 %v834_v34, %s2534_s11  ;;  %v873_v32 = vrot.slane %v866_v12, 4  ;;  %v872_v34 = vsel %vm384_vm3, %v870_v7, %v871_v29 }
 0x12d   : > { %v874_v13 = vsel %vm384_vm3, %v871_v29, %v873_v32  ;;  %v598_v29 = vmul.f32 %v597_v21, %v1799_v35 }
 0x12f   : > { %839 = vrot.lane.b32.xlu1 %v836_v47, %s2534_s11  ;;  %428 = vrot.lane.b32.xlu0 %v1898_v26, %s2534_s11  ;;  %v583_v26 = vsel %vm384_vm3, %v580_v39, %v582_v44  ;;  %v893_v39 = vsel %vm384_vm3, %v891_v1, %v892_v36  ;;  %v895_v47 = vsel %vm384_vm3, %v892_v36, %v894_v10  ;;  %v441_v44 = vstv %s1234_s6  ;;  %s2224_s6 = sld [smem:[#allocation8 + $0x82]] }
 0x130   : > { %v443_v57 = vmul.f32 %v441_v44, %v1739_v20  ;;  %v442_v19 = vmul.f32 %v441_v44, %v1762_v28 }
 0x133   : > { %430 = vrot.lane.b32.xlu1 %v427_v46, %s2534_s11  ;;  %584 = vrot.lane.b32.xlu0 %v581_v58, %s2534_s11 }
 0x137   : > { %586 = vrot.lane.b32.xlu1 %v583_v26, %s2534_s11  ;;  %719 = vrot.lane.b32.xlu0 %v716_v59, %s1531_s30 }
 0x13b   : > { %721 = vrot.lane.b32.xlu1 %v718_v24, %s1531_s30  ;;  %740 = vrot.lane.b32.xlu0 %v737_v11, %s2534_s11 }
 0x13f   : > { %742 = vrot.lane.b32.xlu1 %v739_v54, %s2534_s11  ;;  %875 = vrot.lane.b32.xlu0 %v872_v34, %s1531_s30 }
 0x143   : > { %877 = vrot.lane.b32.xlu1 %v874_v13, %s1531_s30  ;;  %896 = vrot.lane.b32.xlu0 %v893_v39, %s2534_s11  ;;  %s1252_s30 = sld [smem:[#allocation7 + $0x180]] }
 0x147   : > { %898 = vrot.lane.b32.xlu1 %v895_v47, %s2534_s11  ;;  %s2202_s11 = sld [smem:[#allocation8 + $0x300]] }
 0x149   : > { %v753_v31 = vstv %s1252_s30  ;;  %s2228_s30 = sld [smem:[#allocation8 + $0x182]] }
 0x159   : > { %v295_v55 = vpop.permute.xlu0 %294 }
 0x15a   : > { %v300_v42 = vadd.f32 %v295_v55, %v284_v9 }
 0x15d   : > { %v297_v46 = vpop.permute.xlu1 %296  ;;  %v309_v58 = vpop.permute.xlu0 %308 }
 0x15e   : > { %v301_v50 = vadd.f32 %v297_v46, %v285_v23  ;;  %v314_v48 = vadd.f32 %v309_v58, %v300_v42 }
 0x160   : > { %v332_v61 = vadd.f32 %v1976_v41, %v314_v48 }
 0x161   : > { %v311_v17 = vpop.permute.xlu1 %310  ;;  %v455_v26 = vpop.permute.xlu0 %454 }
 0x162   : > { %v315_v6 = vadd.f32 %v311_v17, %v301_v50  ;;  %v459_v16 = vadd.f32 %v455_v26, %v443_v57 }
 0x164   : > { %v333_v14 = vadd.f32 %v1981_v45, %v315_v6 }
 0x165   : > { %v453_v18 = vpop.permute.xlu1 %452  ;;  %v469_v59 = vpop.permute.xlu0 %468 }
 0x166   : > { %v473_v5 = vadd.f32 %v469_v59, %v459_v16  ;;  %v458_v0 = vadd.f32 %v453_v18, %v442_v19 }
 0x168   : > { %v490_v20 = vadd.f32 %v1987_v63, %v473_v5  ;;  %v755_v63 = vmul.f32 %v753_v31, %v1812_v43 }
 0x169   : > { %v467_v24 = vpop.permute.xlu1 %466  ;;  %v611_v41 = vpop.permute.xlu0 %610 }
 0x16a   : > { %v472_v2 = vadd.f32 %v467_v24, %v458_v0  ;;  %v615_v7 = vadd.f32 %v611_v41, %v599_v22 }
 0x16c   : > { %v489_v12 = vadd.f32 %v1984_v49, %v472_v2  ;;  %v754_v49 = vmul.f32 %v753_v31, %v1859_v62  ;;  %v1030_v31 = vstv %s2200_s4  ;;  %s2355_s4 = sld [smem:[#allocation8 + $0x383]] }
 0x16d   : > { %v609_v11 = vpop.permute.xlu1 %608  ;;  %v625_v45 = vpop.permute.xlu0 %624 }
 0x16e   : > { %v629_v51 = vadd.f32 %v625_v45, %v615_v7  ;;  %v614_v28 = vadd.f32 %v609_v11, %v598_v29  ;;  %v930_v11 = vstv %s2189_s23  ;;  %v955_v45 = vstv %s2191_s26  ;;  %s2301_s23 = sld [smem:[#allocation8 + $0x83]] }
 0x16f   : > { %v980_v29 = vstv %s2193_s7  ;;  %s2303_s26 = sld [smem:[#allocation8 + $0x103]] }
 0x170   : > { %v646_v54 = vadd.f32 %v2004_v33, %v629_v51  ;;  %v1005_v51 = vstv %s2195_s28  ;;  %s2343_s7 = sld [smem:[#allocation8 + $0x283]] }
 0x171   : > { %v623_v32 = vpop.permute.xlu1 %622  ;;  %v767_v34 = vpop.permute.xlu0 %766  ;;  %s2353_s28 = sld [smem:[#allocation8 + $0x303]] }
 0x172   : > { %v628_v30 = vadd.f32 %v623_v32, %v614_v28  ;;  %v771_v1 = vadd.f32 %v767_v34, %v755_v63  ;;  %v1080_v32 = vstv %s2204_s10 }
 0x174   : > { %v645_v36 = vadd.f32 %v1991_v4, %v628_v30 }
 0x175   : > { %v765_v52 = vpop.permute.xlu1 %764  ;;  %v781_v13 = vpop.permute.xlu0 %780 }
 0x176   : > { %v785_v39 = vadd.f32 %v781_v13, %v771_v1  ;;  %v770_v10 = vadd.f32 %v765_v52, %v754_v49  ;;  %v934_v52 = vstv %s2208_s1  ;;  %v959_v13 = vstv %s2210_s2 }
 0x178   : > { %v2169_v35 = vadd.f32 %v2014_v8, %v785_v39  ;;  %v984_v39 = vstv %s2212_s17 }
 0x179   : > { %v779_v47 = vpop.permute.xlu1 %778  ;;  %v348_v53 = vpop.permute.xlu0 %347 }
 0x17a   : > { %v784_v33 = vadd.f32 %v779_v47, %v770_v10  ;;  %v353_v9 = vadd.f32 %v348_v53, %v332_v61  ;;  %v1009_v10 = vstv %s2214_s19  ;;  %v1084_v53 = vstv %s2220_s27 }
 0x17c   : > { %v801_v55 = vadd.f32 %v2011_v56, %v784_v33  ;;  %v915_v33 = vstv %s2222_s29 }
 0x17d   : > { %v350_v42 = vpop.permute.xlu1 %349  ;;  %v369_v43 = vpop.permute.xlu0 %368 }
 0x17e   : > { %v374_v23 = vadd.f32 %v369_v43, %v353_v9  ;;  %v354_v62 = vadd.f32 %v350_v42, %v333_v14  ;;  %v940_v42 = vstv %s2224_s6  ;;  %v965_v43 = vstv %s2226_s8 }
 0x180   : > { %v2173_v4 = vadd.f32 %v2019_v40, %v374_v23 }
 0x181   : > { %v505_v46 = vpop.permute.xlu1 %504  ;;  %v507_v58 = vpop.permute.xlu0 %506 }
 0x182   : > { %v510_v44 = vadd.f32 %v505_v46, %v489_v12  ;;  %v511_v17 = vadd.f32 %v507_v58, %v490_v20  ;;  %v905_v12 = vstv %s2187_s9  ;;  %v990_v46 = vstv %s2228_s30  ;;  %s2299_s9 = sld [smem:[#allocation8 + $0x3]] }
 0x183   : > { %v1015_v58 = vstv %s2230_s21 }
 0x185   : > { %v371_v50 = vpop.permute.xlu1 %370  ;;  %v526_v48 = vpop.permute.xlu0 %525 }
 0x186   : > { %v375_v8 = vadd.f32 %v371_v50, %v354_v62  ;;  %v531_v57 = vadd.f32 %v526_v48, %v510_v44  ;;  %v1040_v62 = vstv %s2232_s14  ;;  %v1065_v44 = vstv %s2234_s13  ;;  %s1225_s13 = sshll.u32 %s1694_s5, 7 }
 0x187   : > { %s2396_s14 = scalar_lea.vmem [#allocation10], %s1225_s13 }
 0x188   : > { %v2176_v26 = vadd.f32 %v2022_v60, %v375_v8  ;;  %v2179_v56 = vadd.f32 %v2037_v25, %v531_v57  ;;  %v1090_v8 = vstv %s2238_s18  ;;  %s1312_s18 = sshll.u32 %s1577_s16, 11  ;;  %s1118_s21 = sshll.u32 %s2396_s14, 4  ;;  %s2431_s21 = int_to_ptr.vmem [resolvable:$true] %s1118_s21 }
 0x189   : > { %v528_v61 = vpop.permute.xlu1 %527  ;;  %v661_v6 = vpop.permute.xlu0 %660  ;;  %s1448_s10 = scalar_lea.vmem %s2431_s21, 2048 }
 0x18a   : > { %v532_v16 = vadd.f32 %v528_v61, %v511_v17  ;;  %v666_v40 = vadd.f32 %v661_v6, %v645_v36  ;;  %v909_v36 = vstv %s2206_s0  ;;  %p1449_p5 = scmp.ne.s32.totalorder %s2431_s21, %s1448_s10  ;;  %s1533_s0 = smov [#allocation10]  }
 0x18b   : > { %s1452_s1 = sshll.u32 %s1533_s0, 4  ;;  %s1453_s1 = int_to_ptr.vmem [resolvable:$false] %s1452_s1 }
 0x18c   : > { %v2182_v18 = vadd.f32 %v2044_v27, %v532_v16  ;;  %p1450_p8 = pnand %p1449_p5, %p2535_p2  ;;  %s1454_s2 = scalar_lea.vmem %s1453_s1, 4096 }
 0x18d   : > { %v663_v14 = vpop.permute.xlu1 %662  ;;  %v682_v59 = vpop.permute.xlu0 %681  ;;  %p1455_p4 = scmp.lt.s32.totalorder %s2431_s21, %s1453_s1  ;;  %p1456_p12 = scmp.lt.s32.totalorder %s1454_s2, %s1448_s10 }
 0x18e   : > { %v687_v21 = vadd.f32 %v682_v59, %v666_v40  ;;  %v667_v19 = vadd.f32 %v663_v14, %v646_v54  ;;  %v1055_v54 = vstv %s2202_s11  ;;  %s1105_s11 = scalar_lea.sflag [#allocation5], %s1694_s5  ;;  %p1451_p10 = pneg %p1450_p8 }
 0x18f   : > { %p1457_p0 = por %p1456_p12, %p1455_p4 }
 0x190   : > { %v2185_v5 = vadd.f32 %v2057_v3, %v687_v21 }
 0x191   : > { %v684_v0 = vpop.permute.xlu1 %683  ;;  %v817_v60 = vpop.permute.xlu0 %816  ;;  %p1458_p7 = pnand %p1457_p0, %p1451_p10 }
 0x192   : > { %v688_v22 = vadd.f32 %v684_v0, %v667_v19  ;;  %v822_v24 = vadd.f32 %v817_v60, %v801_v55 }
 0x194   : > { %v2198_v25 = vadd.f32 %v2060_v37, %v688_v22 }
 0x195   : > { %v819_v27 = vpop.permute.xlu1 %818  ;;  %v408_v20 = vpop.permute.xlu0 %407 }
 0x196   : > { %v823_v28 = vadd.f32 %v819_v27, %v2169_v35  ;;  %v413_v30 = vadd.f32 %v408_v20, %v2173_v4  ;;  %v1034_v35 = vstv %s2216_s20 }
 0x199   : > { %v410_v3 = vpop.permute.xlu1 %409  ;;  %v564_v37 = vpop.permute.xlu0 %563 }
 0x19a   : > { %v414_v9 = vadd.f32 %v410_v3, %v2176_v26  ;;  %v569_v55 = vadd.f32 %v564_v37, %v2179_v56 }
 0x19d   : > { %v566_v41 = vpop.permute.xlu1 %565  ;;  %v838_v2 = vpop.permute.xlu0 %837 }
 0x19e   : > { %v843_v7 = vadd.f32 %v838_v2, %v822_v24  ;;  %v570_v17 = vadd.f32 %v566_v41, %v2182_v18 }
 0x1a0   : > { %v2248_v34 = vadd.f32 %v2065_v15, %v843_v7  ;;  %v1059_v15 = vstv %s2218_s22 }
 0x1a1   : > { %v840_v63 = vpop.permute.xlu1 %839  ;;  %v429_v1 = vpop.permute.xlu0 %428 }
 0x1a2   : > { %v844_v49 = vadd.f32 %v840_v63, %v823_v28  ;;  %v434_v47 = vadd.f32 %v429_v1, %v413_v30 }
 0x1a4   : > { %v2270_v57 = vadd.f32 %v2068_v38, %v844_v49  ;;  %v906_v26 = vmul.f32 %v905_v12, %v434_v47  ;;  %v931_v56 = vmul.f32 %v930_v11, %v434_v47  ;;  %v956_v61 = vmul.f32 %v955_v45, %v434_v47 }
 0x1a5   : > { %v431_v23 = vpop.permute.xlu1 %430  ;;  %v585_v4 = vpop.permute.xlu0 %584  ;;  %v981_v6 = vmul.f32 %v980_v29, %v434_v47  ;;  %v1006_v16 = vmul.f32 %v1005_v51, %v434_v47  ;;  %v1031_v40 = vmul.f32 %v1030_v31, %v434_v47  ;;  %v1056_v38 = vmul.f32 %v1055_v54, %v434_v47 }
 0x1a6   : > { %v435_v50 = vadd.f32 %v431_v23, %v414_v9  ;;  %v590_v48 = vadd.f32 %v585_v4, %v569_v55  ;;  %v1081_v14 = vmul.f32 %v1080_v32, %v434_v47 }
 0x1a8   : > { %v907_v18 = vmul.f32 %v905_v12, %v435_v50  ;;  %v932_v59 = vmul.f32 %v930_v11, %v435_v50  ;;  %v957_v21 = vmul.f32 %v955_v45, %v435_v50  ;;  %v910_v60 = vmul.f32 %v909_v36, %v590_v48 }
 0x1a9   : > { %v587_v19 = vpop.permute.xlu1 %586  ;;  %v720_v0 = vpop.permute.xlu0 %719  ;;  %v935_v22 = vmul.f32 %v934_v52, %v590_v48  ;;  %v960_v27 = vmul.f32 %v959_v13, %v590_v48  ;;  %v985_v20 = vmul.f32 %v984_v39, %v590_v48  ;;  %v1010_v3 = vmul.f32 %v1009_v10, %v590_v48 }
 0x1aa   : > { %v1035_v37 = vmul.f32 %v1034_v35, %v590_v48  ;;  %v1060_v24 = vmul.f32 %v1059_v15, %v590_v48  ;;  %v1085_v41 = vmul.f32 %v1084_v53, %v590_v48  ;;  %v912_v2 = vadd.f32 %v910_v60, %v906_v26 }
 0x1ab   : > { %v937_v7 = vadd.f32 %v935_v22, %v931_v56  ;;  %v962_v12 = vadd.f32 %v960_v27, %v956_v61  ;;  %v987_v11 = vadd.f32 %v985_v20, %v981_v6  ;;  %v1012_v45 = vadd.f32 %v1010_v3, %v1006_v16 }
 0x1ac   : > { %v1037_v28 = vadd.f32 %v1035_v37, %v1031_v40  ;;  %v1062_v30 = vadd.f32 %v1060_v24, %v1056_v38  ;;  %v1087_v63 = vadd.f32 %v1085_v41, %v1081_v14  ;;  %v982_v47 = vmul.f32 %v980_v29, %v435_v50 }
 0x1ad   : > { %v722_v1 = vpop.permute.xlu1 %721  ;;  %v741_v49 = vpop.permute.xlu0 %740  ;;  %v1007_v9 = vmul.f32 %v1005_v51, %v435_v50  ;;  %v1032_v55 = vmul.f32 %v1030_v31, %v435_v50  ;;  %v591_v23 = vadd.f32 %v587_v19, %v570_v17  ;;  %v1057_v4 = vmul.f32 %v1055_v54, %v435_v50 }
 0x1ae   : > { %v1082_v48 = vmul.f32 %v1080_v32, %v435_v50  ;;  %v725_v26 = vadd.f32 %v720_v0, %v2185_v5  ;;  %v726_v56 = vadd.f32 %v722_v1, %v2198_v25  ;;  %v946_v40 = vstv %s2301_s23 }
 0x1af   : > { %v911_v61 = vmul.f32 %v909_v36, %v591_v23  ;;  %v936_v6 = vmul.f32 %v934_v52, %v591_v23  ;;  %v961_v16 = vmul.f32 %v959_v13, %v591_v23  ;;  %v986_v29 = vmul.f32 %v984_v39, %v591_v23 }
 0x1b0   : > { %v1011_v51 = vmul.f32 %v1009_v10, %v591_v23  ;;  %v1036_v31 = vmul.f32 %v1034_v35, %v591_v23  ;;  %v1061_v54 = vmul.f32 %v1059_v15, %v591_v23  ;;  %v1086_v5 = vmul.f32 %v1084_v53, %v591_v23 }
 0x1b1   : > { %v913_v25 = vadd.f32 %v911_v61, %v907_v18  ;;  %v938_v32 = vadd.f32 %v936_v6, %v932_v59  ;;  %v963_v36 = vadd.f32 %v961_v16, %v957_v21  ;;  %v988_v52 = vadd.f32 %v986_v29, %v982_v47  ;;  %v743_v13 = vpop.permute.xlu1 %742  ;;  %v876_v39 = vpop.permute.xlu0 %875 }
 0x1b2   : > { %v1013_v10 = vadd.f32 %v1011_v51, %v1007_v9  ;;  %v1038_v50 = vadd.f32 %v1036_v31, %v1032_v55  ;;  %v1063_v35 = vadd.f32 %v1061_v54, %v1057_v4  ;;  %v1088_v17 = vadd.f32 %v1086_v5, %v1082_v48 }
 0x1b3   : > { %v746_v15 = vadd.f32 %v741_v49, %v725_v26  ;;  %v921_v53 = vstv %s2299_s9  ;;  %v971_v38 = vstv %s2303_s26  ;;  %v747_v14 = vadd.f32 %v743_v13, %v726_v56 }
 0x1b4   : > { %v881_v18 = vadd.f32 %v876_v39, %v2248_v34  ;;  %v996_v59 = vstv %s2305_s15  ;;  %v1021_v21 = vstv %s2307_s25  ;;  %v1071_v61 = vstv %s2353_s28  ;;  %s2429_s25 = scalar_lea.hbm %s2494_s3, %s1312_s18 }
 0x1b5   : > { %v916_v19 = vmul.f32 %v915_v33, %v746_v15  ;;  %v941_v0 = vmul.f32 %v940_v42, %v746_v15  ;;  %v966_v60 = vmul.f32 %v965_v43, %v746_v15  ;;  %v991_v22 = vmul.f32 %v990_v46, %v746_v15 }
 0x1b6   : > { %v1016_v34 = vmul.f32 %v1015_v58, %v746_v15  ;;  %v1041_v27 = vmul.f32 %v1040_v62, %v746_v15  ;;  %v1066_v20 = vmul.f32 %v1065_v44, %v746_v15  ;;  %v1091_v3 = vmul.f32 %v1090_v8, %v746_v15 }
 0x1b7   : > { %v918_v37 = vadd.f32 %v916_v19, %v912_v2  ;;  %v943_v24 = vadd.f32 %v941_v0, %v937_v7  ;;  %v968_v41 = vadd.f32 %v966_v60, %v962_v12  ;;  %v993_v1 = vadd.f32 %v991_v22, %v987_v11  ;;  %v878_v11 = vpop.permute.xlu1 %877 }
 0x1b8   : > { %v1018_v49 = vadd.f32 %v1016_v34, %v1012_v45  ;;  %v1043_v47 = vadd.f32 %v1041_v27, %v1037_v28  ;;  %v1068_v9 = vadd.f32 %v1066_v20, %v1062_v30  ;;  %v1093_v55 = vadd.f32 %v1091_v3, %v1087_v63 }
 0x1b9   : > { %v917_v23 = vmul.f32 %v915_v33, %v747_v14  ;;  %v942_v4 = vmul.f32 %v940_v42, %v747_v14  ;;  %v967_v48 = vmul.f32 %v965_v43, %v747_v14  ;;  %v992_v26 = vmul.f32 %v990_v46, %v747_v14  ;;  %v897_v33 = vpop.permute.xlu0 %896 }
 0x1ba   : > { %v1017_v56 = vmul.f32 %v1015_v58, %v747_v14  ;;  %v1042_v2 = vmul.f32 %v1040_v62, %v747_v14  ;;  %v1067_v7 = vmul.f32 %v1065_v44, %v747_v14  ;;  %v1092_v12 = vmul.f32 %v1090_v8, %v747_v14 }
 0x1bb   : > { %v919_v42 = vadd.f32 %v917_v23, %v913_v25  ;;  %v944_v43 = vadd.f32 %v942_v4, %v938_v32  ;;  %v969_v45 = vadd.f32 %v967_v48, %v963_v36  ;;  %v994_v46 = vadd.f32 %v992_v26, %v988_v52  ;;  %v899_v36 = vpop.permute.xlu1 %898 }
 0x1bc   : > { %v1019_v58 = vadd.f32 %v1017_v56, %v1013_v10  ;;  %v1044_v28 = vadd.f32 %v1042_v2, %v1038_v50  ;;  %v1069_v30 = vadd.f32 %v1067_v7, %v1063_v35  ;;  %v1094_v62 = vadd.f32 %v1092_v12, %v1088_v17 }
 0x1bd   : > { %v1046_v63 = vstv %s2343_s7  ;;  %v1096_v44 = vstv %s2355_s4  ;;  %v902_v8 = vadd.f32 %v897_v33, %v881_v18  ;;  %v882_v6 = vadd.f32 %v878_v11, %v2270_v57 }
 0x1bf   : > { %v922_v16 = vmul.f32 %v921_v53, %v902_v8  ;;  %v947_v29 = vmul.f32 %v946_v40, %v902_v8  ;;  %v972_v51 = vmul.f32 %v971_v38, %v902_v8  ;;  %v997_v31 = vmul.f32 %v996_v59, %v902_v8 }
 0x1c0   : > { %v1022_v54 = vmul.f32 %v1021_v21, %v902_v8  ;;  %v1047_v5 = vmul.f32 %v1046_v63, %v902_v8  ;;  %v1072_v25 = vmul.f32 %v1071_v61, %v902_v8  ;;  %v1097_v32 = vmul.f32 %v1096_v44, %v902_v8 }
 0x1c1   : > { %v924_v52 = vadd.f32 %v922_v16, %v918_v37  ;;  %v949_v13 = vadd.f32 %v947_v29, %v943_v24  ;;  %v974_v39 = vadd.f32 %v972_v51, %v968_v41  ;;  %v999_v57 = vadd.f32 %v997_v31, %v993_v1 }
 0x1c2   : > { %v1024_v10 = vadd.f32 %v1022_v54, %v1018_v49  ;;  %v1049_v50 = vadd.f32 %v1047_v5, %v1043_v47  ;;  %v1074_v35 = vadd.f32 %v1072_v25, %v1068_v9  ;;  %v1099_v17 = vadd.f32 %v1097_v32, %v1093_v55 }
 0x1c3   : > { %927 = vst.msk [vmem:[%s2396_s14] sm:$0xff] %vm926_vm5, %v924_v52  ;;  %1268 = vst.msk [vmem:[%s2396_s14 + $0x10] sm:$0xff] %vm926_vm5, %v949_v13  ;;  %v903_v15 = vadd.f32 %v899_v36, %v882_v6 }
 0x1c4   : > { %1274 = vst.msk [vmem:[%s2396_s14 + $0x20] sm:$0xff] %vm926_vm5, %v974_v39  ;;  %1280 = vst.msk [vmem:[%s2396_s14 + $0x30] sm:$0xff] %vm926_vm5, %v999_v57 }
 0x1c5   : > { %1286 = vst.msk [vmem:[%s2396_s14 + $0x40] sm:$0xff] %vm926_vm5, %v1024_v10  ;;  %1292 = vst.msk [vmem:[%s2396_s14 + $0x50] sm:$0xff] %vm926_vm5, %v1049_v50  ;;  %v923_v14 = vmul.f32 %v921_v53, %v903_v15  ;;  %v948_v18 = vmul.f32 %v946_v40, %v903_v15  ;;  %v973_v19 = vmul.f32 %v971_v38, %v903_v15 }
 0x1c6   : > { %1298 = vst.msk [vmem:[%s2396_s14 + $0x60] sm:$0xff] %vm926_vm5, %v1074_v35  ;;  %1304 = vst.msk [vmem:[%s2396_s14 + $0x70] sm:$0xff] %vm926_vm5, %v1099_v17  ;;  %v998_v0 = vmul.f32 %v996_v59, %v903_v15  ;;  %v1023_v60 = vmul.f32 %v1021_v21, %v903_v15  ;;  %v1048_v22 = vmul.f32 %v1046_v63, %v903_v15 }
 0x1c7   : > { %v1073_v34 = vmul.f32 %v1071_v61, %v903_v15  ;;  %v1098_v27 = vmul.f32 %v1096_v44, %v903_v15  ;;  %v925_v20 = vadd.f32 %v923_v14, %v919_v42  ;;  %v950_v53 = vadd.f32 %v948_v18, %v944_v43 }
 0x1c8   : > { %v975_v40 = vadd.f32 %v973_v19, %v969_v45  ;;  %v1000_v38 = vadd.f32 %v998_v0, %v994_v46  ;;  %v1025_v59 = vadd.f32 %v1023_v60, %v1019_v58  ;;  %v1050_v21 = vadd.f32 %v1048_v22, %v1044_v28 }
 0x1c9   : > { %v1075_v3 = vadd.f32 %v1073_v34, %v1069_v30  ;;  %v1100_v37 = vadd.f32 %v1098_v27, %v1094_v62  ;;  %928 = vst.msk [vmem:[%s2396_s14 + $0x8] sm:$0xff] %vm926_vm5, %v925_v20  ;;  %1269 = vst.msk [vmem:[%s2396_s14 + $0x18] sm:$0xff] %vm926_vm5, %v950_v53 }
 0x1ca   : > { %1275 = vst.msk [vmem:[%s2396_s14 + $0x28] sm:$0xff] %vm926_vm5, %v975_v40  ;;  %1281 = vst.msk [vmem:[%s2396_s14 + $0x38] sm:$0xff] %vm926_vm5, %v1000_v38 }
 0x1cb   : > { %1287 = vst.msk [vmem:[%s2396_s14 + $0x48] sm:$0xff] %vm926_vm5, %v1025_v59  ;;  %1293 = vst.msk [vmem:[%s2396_s14 + $0x58] sm:$0xff] %vm926_vm5, %v1050_v21 }
 0x1cc   : > { %1299 = vst.msk [vmem:[%s2396_s14 + $0x68] sm:$0xff] %vm926_vm5, %v1075_v3  ;;  %1305 = vst.msk [vmem:[%s2396_s14 + $0x78] sm:$0xff] %vm926_vm5, %v1100_v37 }
 0x1cd   : > { %1461 = shalt.err (!%p1458_p7)
}
 0x1ce   : > { %s1462_s17 = scalar_lea.hbm %s2429_s25, 2048  ;;  %s1466_s22 = scalar_lea.hbm %s2494_s3, 4096 }
 0x1cf   : > { %p1463_p11 = scmp.ne.s32.totalorder %s2429_s25, %s1462_s17  ;;  %p1467_p3 = scmp.lt.u32.totalorder %s2429_s25, %s2494_s3 }
 0x1d0   : > { %p1468_p9 = scmp.lt.u32.totalorder %s1466_s22, %s1462_s17  ;;  %p1470_p5 = scmp.lt.u32.totalorder %s1462_s17, %s2429_s25 }
 0x1d1   : > { %p1464_p13 = pnand %p1463_p11, %p2535_p2 }
 0x1d2   : > { %p1469_p1 = por %p1468_p9, %p1467_p3 }
 0x1d3   : > { %p1465_p6 = pneg %p1464_p13 }
 0x1d4   : > { %p1471_p8 = por %p1470_p5, %p1469_p1 }
 0x1d6   : > { %p1472_p10 = pnand %p1471_p8, %p1465_p6 }
 0x1d8   : > { %1475 = shalt.err (!%p1472_p10)
}
 0x1d9   : > { %s1534_s6 = smov 128   ;;  %s1535_s8 = smov 8  }
 0x1da   : > { %1323 = dma.vmem_to_hbm [thread:$0]  (%p2535_p2), %s2431_s21, 2048, %s2429_s25, %s1105_s11, %s1534_s6, %s1534_s6, %s1535_s8  }
 0x1db PF: > { %s2536_s30 = sld [smem:[#allocation20_spill]]  ;;  %s2537_s9 = sld [smem:[#allocation17_spill]] }
 0x1dc   : > { %s1133_s23 = sand.u32 1, %s1510_s12  }
 0x1dd   : > { %s1134_s26 = scalar_lea.sflag [#allocation5], %s1133_s23 }
 0x1e1   : > { %p2538_p4 = scmp.ne.s32.totalorder %s2536_s30, 0  ;;  %p2539_p12 = scmp.ge.s32.totalorder %s2537_s9, 2 }
 0x1e3   : > { %p1337_p0 = pnand %p2539_p12, %p2538_p4 }
 0x1e5   : > { %1505 = dma.done.wait (!%p1337_p0), %s1134_s26, 2048  }
 0x1e6   : > { %1507 = vsyncadd (!%p1337_p0), %s1134_s26, 4294965248  ;;  %s2540_s15 = sld [smem:[#allocation18_spill]]  ;;  %s2541_s12 = sld [smem:[#allocation15_spill]] }
 0x1e7   : > { %s2542_s13 = sld [smem:[#allocation16_spill]]  ;;  %s2543_s14 = sld [smem:[#allocation19_spill]] }
 0x1ec   : > { %p18_p7 = scmp.ge.s32.totalorder %s2540_s15, 4  }
 0x1ee   :  { %20 = sbr.rel (!%p18_p7) target bundleno = 11 (0xb), region = 96 }
 0x1f5   :  { %1139 = vsyncpa [#allocation4], 1 }
 0x1f6   :  { %1141 = vsyncpa [#allocation4 + $0x1], 1 }
 0x1f7   :  { %1142 = vsyncpa [#allocation5], 1 }
 0x1f8   :  { %1144 = vsyncpa [#allocation5 + $0x1], 1 }
 0x1f9   :  { %1145 = vsyncpa [#allocation6], 1 }
 0x1fa   :  { %1147 = vsyncpa [#allocation6 + $0x1], 1 }
 0x1fb   :  { %1148 = vsyncpa [#allocation9], 1 }

</bundles_post_ra>
